<compile_context>
chip_gen: v7x
topology: tpu7x:2x2x1
jax: 0.10.0
libtpu: 0.0.40
codegen_flags: <defaults>
</compile_context>

<pallas_src>
import functools

import jax
import jax.numpy as jnp
from jax import lax
from jax.experimental import pallas as pl
from jax.experimental.pallas import tpu as pltpu

LANE = 128


# --------------------------------------------------------------------------
# Fused kernel: bn1->relu->conv1(+bn2 scale)->(+bn2 bias)->relu
#               ->conv2(+bn3 scale)->(+bn3 bias)->relu->conv3->(+residual)
# Grid = (batch groups, L tiles).  One grid step:
#   * waits on the manually-DMA'd halo window for (this batch group, this tile)
#   * prefetches the next tile's window of the same batch group
#   * runs 3 convs as K accumulating (nb*Wn, Cp) @ (Cp, Cp) bf16 MXU matmuls.
# --------------------------------------------------------------------------
def _basic_block_kernel(x_hbm, w_ref, bn_ref, o_ref, xbuf, sem, *,
                        K, P, TL, H, L, nb, res):
    b = pl.program_id(0)                     # batch-group index
    j = pl.program_id(1)                     # L-tile index
    nL = pl.num_programs(1)
    Wn = TL + 2 * H                          # window rows per batch element
    R = nb * Wn                              # stacked rows fed to the MXU

    # ---- manual double-buffered fetch of the halo'd input window ----------
    def window_copy(jj, slot):
        start = pl.multiple_of(jj * TL, 8)
        return pltpu.make_async_copy(
            x_hbm.at[pl.ds(b * nb, nb), pl.ds(start, Wn), :],
            xbuf.at[slot],
            sem.at[slot])

    slot = lax.rem(j, 2)

    @pl.when(j == 0)                         # first tile of this batch group
    def _():
        window_copy(j, slot).start()

    window_copy(j, slot).wait()              # started here (j==0) or by step j-1

    @pl.when(j + 1 < nL)                     # prefetch next tile, same group
    def _():
        window_copy(j + 1, 1 - slot).start()

    xw3 = xbuf[slot]                         # (nb, Wn, Cp) f32
    Cp = xw3.shape[-1]
    xw = xw3.reshape(R, Cp)                  # layout no-op (Wn % 8 == 0)

    bn = bn_ref[...]                         # (8, Cp) packed: s1, b1, b2, b3, 0..
    s1, b1 = bn[0:1, :], bn[1:2, :]
    b2, b3 = bn[2:3, :], bn[3:4, :]

    # Rows of each window lying inside the real sequence [0, L).  Applied as a
    # 0/1 multiply after relu (equivalent to a select since relu output >= 0);
    # this enforces conv's "same" zero padding on the post-bn/relu activations.
    row = lax.broadcasted_iota(jnp.int32, (Wn, 1), 0)
    pos = j * TL - H + row
    m = jnp.logical_and(pos >= 0, pos < L).astype(jnp.float32)     # (Wn, 1)
    mask = m if nb == 1 else jnp.concatenate([m] * nb, axis=0)     # (R, 1)

    def conv(a, ci):
        # 'same' 1-D conv as K accumulating (R, Cp) @ (Cp, Cp) MXU matmuls over
        # sublane-rolled taps (XLU slot, ~free).  Roll wrap / cross-window rows
        # only contaminate rows within 3*P of a window edge, which never reach
        # the central [H, H+TL) output rows because H >= 3*P.
        acc = None
        for k in range(K):
            shift = (P - k) % R
            tap = a if shift == 0 else pltpu.roll(a, shift, 0)
            d = jnp.dot(tap.astype(w_ref.dtype), w_ref[ci, k],
                        preferred_element_type=jnp.float32)
            acc = d if acc is None else acc + d
        return acc

    zero = jnp.float32(0.0)
    a = jnp.maximum(xw * s1 + b1, zero) * mask         # bn1 + relu (masked)
    a = jnp.maximum(conv(a, 0) + b2, zero) * mask      # conv1 (+bn2) + relu
    a = jnp.maximum(conv(a, 1) + b3, zero) * mask      # conv2 (+bn3) + relu
    y = conv(a, 2)                                     # conv3  -> (R, Cp) f32

    y = y.reshape(nb, Wn, Cp)[:, H:H + TL, :]          # central rows (8-aligned)
    if res:
        y = y + xw3[:, H:H + TL, :]                    # residual = pre-bn1 x
    o_ref[...] = y.astype(o_ref.dtype)


# --------------------------------------------------------------------------
# Wrapper: BN folding, weight prep, chip-aware tile sizing, pallas_call.
# --------------------------------------------------------------------------
def _ceil_to(v, m):
    return -(-v // m) * m


def _vmem_capacity_bytes(default=128 * 1024 * 1024):
    try:
        info = pltpu.get_tpu_info()
        return int(getattr(info, "vmem_capacity_bytes", default))
    except Exception:
        return default


def _working_set_bytes(nb, TL, H, Cp, K, w_buffers, w_itemsize):
    Wn = TL + 2 * H
    xbuf = 2 * nb * Wn * Cp * 4                    # double-buffered input windows
    obuf = 2 * nb * TL * Cp * 4                    # double-buffered output tiles
    wgt = w_buffers * 3 * K * Cp * Cp * w_itemsize
    tmp = 8 * nb * Wn * Cp * 4                     # activations / taps / accums
    return xbuf + obuf + wgt + tmp + 64 * 1024


def basic_block_1d(x, params, *, stride=1, downsample=None, res=True,
                   tl_max=None, use_bf16_mxu=True):
    """x: (N, Cin, L) float32 (PyTorch NCL).  Returns (N, planes, L) float32."""
    assert stride == 1 and downsample is None, \
        "only stride=1 / downsample=None is supported"
    N, Cin, L = x.shape
    w1, w2, w3 = params["w1"], params["w2"], params["w3"]    # (Co, Ci, K) each
    planes, _, K = w1.shape
    assert K % 2 == 1, "kernel assumes odd conv size ('same' padding)"
    P = (K - 1) // 2
    eps = 1e-5
    if res:
        assert Cin == planes, "residual add requires inplanes == planes"

    Cp = _ceil_to(max(Cin, planes), LANE)          # lane-dense channel width
    H = _ceil_to(3 * P, 8)                         # halo, sublane-aligned
    assert H >= 3 * P, "halo must cover the 3-conv receptive field"

    # ---- chip-aware tile sizing --------------------------------------------
    vmem_cap = _vmem_capacity_bytes()
    w_itemsize = 2 if use_bf16_mxu else 4
    w_buffers = 1 if Cp >= 256 else 2              # single-buffer weights at big Cp
    if tl_max is None:
        # v5e/v6e (128 MiB VMEM): bigger L tiles; v7x (64 MiB): keep headroom.
        tl_max = 1024 if vmem_cap >= 96 * 1024 * 1024 else 512
    TL = min(_ceil_to(tl_max, 8), _ceil_to(L, 8))
    budget = min(int(vmem_cap * 0.5), 64 * 1024 * 1024)
    while TL > 8 and _working_set_bytes(1, TL, H, Cp, K, w_buffers,
                                        w_itemsize) > budget:
        TL = _ceil_to(TL // 2, 8)
    nL = -(-L // TL)
    Wn = TL + 2 * H

    # Fold several batch rows per grid step (fills the MXU M dimension and
    # amortizes per-step overhead when channels are narrow).
    nb = 1
    while (nb * 2 <= N and (nb * 2) * Wn <= 4096 and
           _working_set_bytes(nb * 2, TL, H, Cp, K, w_buffers,
                              w_itemsize) <= budget):
        nb *= 2
    N_pad = _ceil_to(N, nb)

    # ---- fold eval-mode BN into per-channel scale/bias ---------------------
    def fold_bn(gamma, beta, mean, var):
        scale = gamma / jnp.sqrt(var + eps)
        return scale, beta - mean * scale

    s1, b1 = fold_bn(*params["bn1"])   # (Cin,)
    s2, b2 = fold_bn(*params["bn2"])   # (planes,)
    s3, b3 = fold_bn(*params["bn3"])   # (planes,)

    bn_pack = jnp.zeros((8, Cp), jnp.float32)
    bn_pack = bn_pack.at[0, :Cin].set(s1.astype(jnp.float32))
    bn_pack = bn_pack.at[1, :Cin].set(b1.astype(jnp.float32))
    bn_pack = bn_pack.at[2, :planes].set(b2.astype(jnp.float32))
    bn_pack = bn_pack.at[3, :planes].set(b3.astype(jnp.float32))

    # ---- weights: (Co,Ci,K) -> (K, Cp, Cp) per conv, bn scales folded in f32,
    #      then cast to bf16 for the MXU (accumulation stays f32 in-kernel) ---
    def prep_w(w, out_scale):
        Co, Ci, _ = w.shape
        wt = jnp.transpose(w, (2, 1, 0)).astype(jnp.float32)     # (K, Ci, Co)
        if out_scale is not None:                                # fold bn scale
            wt = wt * out_scale.astype(jnp.float32)[None, None, :]
        return jnp.pad(wt, ((0, 0), (0, Cp - Ci), (0, Cp - Co)))

    w_all = jnp.stack([prep_w(w1, s2),      # conv1 followed by bn2: fold s2
                       prep_w(w2, s3),      # conv2 followed by bn3: fold s3
                       prep_w(w3, None)])   # (3, K, Cp, Cp)
    w_all = w_all.astype(jnp.bfloat16 if use_bf16_mxu else jnp.float32)

    # ---- input: NCL -> NLC, channel pad to Cp, halo pad L, pad batch --------
    # No window gather: the kernel DMAs each overlapping halo window straight
    # out of this array.
    x_nlc = jnp.transpose(x, (0, 2, 1)).astype(jnp.float32)      # (N, L, Cin)
    x_src = jnp.pad(
        x_nlc, ((0, N_pad - N), (H, nL * TL - L + H), (0, Cp - Cin)))

    kernel = functools.partial(_basic_block_kernel,
                               K=K, P=P, TL=TL, H=H, L=L, nb=nb, res=res)

    # Constant index_map => weights are fetched once; at big Cp also request a
    # single buffer so the resident copy is not duplicated (saves VMEM on v7x).
    w_kwargs = dict(pipeline_mode=pl.Buffered(1)) if w_buffers == 1 else {}

    ws = _working_set_bytes(nb, TL, H, Cp, K, w_buffers, w_itemsize)
    vmem_limit = int(min(max(2 * ws, 24 * 1024 * 1024),
                         vmem_cap - 16 * 1024 * 1024))

    out = pl.pallas_call(
        kernel,
        out_shape=jax.ShapeDtypeStruct((N_pad, nL * TL, Cp), jnp.float32),
        grid_spec=pltpu.PrefetchScalarGridSpec(
            num_scalar_prefetch=0,
            grid=(N_pad // nb, nL),
            in_specs=[
                pl.BlockSpec(memory_space=pl.ANY),                       # x (HBM)
                pl.BlockSpec((3, K, Cp, Cp), lambda b, j: (0, 0, 0, 0),
                             **w_kwargs),                                # weights
                pl.BlockSpec((8, Cp), lambda b, j: (0, 0)),              # bn pack
            ],
            out_specs=pl.BlockSpec((nb, TL, Cp), lambda b, j: (b, j, 0)),
            scratch_shapes=[
                pltpu.VMEM((2, nb, Wn, Cp), jnp.float32),  # dbl-buffered window
                pltpu.SemaphoreType.DMA((2,)),
            ]),
        compiler_params=pltpu.CompilerParams(
            # j axis must stay sequential per core (prefetch chain); the batch
            # group axis can be split across cores (v7x megacore).
            dimension_semantics=("parallel", "arbitrary"),
            vmem_limit_bytes=vmem_limit),
    )(x_src, w_all, bn_pack)

    out = out[:N, :L, :planes]                       # drop batch/L/channel pad
    return jnp.transpose(out, (0, 2, 1))             # (N, planes, L)


# --------------------------------------------------------------------------
# Pure-JAX reference (eval-mode BN) for correctness checking.
# --------------------------------------------------------------------------
def ref_forward(x, params, *, res=True):
    eps = 1e-5

    def bn(h, g, b, m, v):
        g, b, m, v = (t[None, :, None] for t in (g, b, m, v))
        return (h - m) / jnp.sqrt(v + eps) * g + b

    def conv(h, w):
        pad = (w.shape[-1] - 1) // 2
        return jax.lax.conv_general_dilated(
            h, w, window_strides=(1,), padding=[(pad, pad)],
            dimension_numbers=("NCH", "OIH", "NCH"),
            precision=jax.lax.Precision.HIGHEST)

    out = jax.nn.relu(bn(x, *params["bn1"]))
    out = conv(out, params["w1"])
    out = jax.nn.relu(bn(out, *params["bn2"]))
    out = conv(out, params["w2"])
    out = jax.nn.relu(bn(out, *params["bn3"]))
    out = conv(out, params["w3"])
    if res:
        out = out + x
    return out


# --------------------------------------------------------------------------
if __name__ == "__main__":
    key = jax.random.PRNGKey(0)
    N, C, L, K = 2, 8, 16, 3           # inplanes == planes == 8 (res path valid)

    ks = jax.random.split(key, 16)
    x = jax.random.normal(ks[0], (N, C, L), jnp.float32)

    params = {
        "w1": 0.2 * jax.random.normal(ks[1], (C, C, K), jnp.float32),
        "w2": 0.2 * jax.random.normal(ks[2], (C, C, K), jnp.float32),
        "w3": 0.2 * jax.random.normal(ks[3], (C, C, K), jnp.float32),
        # BN params: (gamma, beta, running_mean, running_var)
        "bn1": (1.0 + 0.1 * jax.random.normal(ks[4], (C,), jnp.float32),
                0.1 * jax.random.normal(ks[5], (C,), jnp.float32),
                0.1 * jax.random.normal(ks[6], (C,), jnp.float32),
                0.5 + jnp.abs(jax.random.normal(ks[7], (C,), jnp.float32))),
        "bn2": (1.0 + 0.1 * jax.random.normal(ks[8], (C,), jnp.float32),
                0.1 * jax.random.normal(ks[9], (C,), jnp.float32),
                0.1 * jax.random.normal(ks[10], (C,), jnp.float32),
                0.5 + jnp.abs(jax.random.normal(ks[11], (C,), jnp.float32))),
        "bn3": (1.0 + 0.1 * jax.random.normal(ks[12], (C,), jnp.float32),
                0.1 * jax.random.normal(ks[13], (C,), jnp.float32),
                0.1 * jax.random.normal(ks[14], (C,), jnp.float32),
                0.5 + jnp.abs(jax.random.normal(ks[15], (C,), jnp.float32))),
    }

    out = jax.block_until_ready(basic_block_1d(x, params, res=True))
    ref = jax.block_until_ready(ref_forward(x, params, res=True))

    assert out.shape == (N, C, L) and out.dtype == jnp.float32
    # bf16 MXU operands (f32 accumulation) vs f32 reference -> looser tolerance.
    assert jnp.allclose(out, ref, rtol=5e-2, atol=5e-2), "mismatch vs reference"

    print("KERNEL_OK")
</pallas_src>

<mosaic_0001>
module attributes {stable_mosaic.version = 11 : i64} {
  func.func @_basic_block_kernel(%arg0: i32, %arg1: i32, %arg2: memref<2x32x128xf32, #tpu.memory_space<any>>, %arg3: memref<3x3x128x128xbf16, #tpu.memory_space<vmem>>, %arg4: memref<8x128xf32, #tpu.memory_space<vmem>>, %arg5: memref<2x16x128xf32, #tpu.memory_space<vmem>>, %arg6: memref<2x2x32x128xf32, #tpu.memory_space<vmem>>, %arg7: memref<2x!tpu.dma_semaphore, #tpu.memory_space<semaphore_mem>>) attributes {dimension_semantics = [#tpu.dimension_semantics<parallel>, #tpu.dimension_semantics<arbitrary>], iteration_bounds = array<i64: 1, 1>, scalar_prefetch = 0 : i64, scratch_operands = 2 : i64, tpu.core_type = #tpu.core_type<tc>, window_params = [{}, {pipeline_mode = #tpu.pipeline_mode<synchronous>, transform_indices = @transform_1, window_bounds = array<i64: 3, 3, 128, 128>}, {pipeline_mode = #tpu.pipeline_mode<synchronous>, transform_indices = @transform_2, window_bounds = array<i64: 8, 128>}, {transform_indices = @transform_3, window_bounds = array<i64: 2, 16, 128>}]} {
    %c2_i32 = arith.constant 2 : i32
    %0 = arith.remsi %arg1, %c2_i32 : i32
    %c0_i32 = arith.constant 0 : i32
    %1 = arith.cmpi eq, %arg1, %c0_i32 : i32
    %2 = arith.extui %1 : i1 to i32
    %c0_i32_0 = arith.constant 0 : i32
    %3 = arith.cmpi ne, %2, %c0_i32_0 : i32
    scf.if %3 {
      %c16_i32_68 = arith.constant 16 : i32
      %111 = arith.muli %arg1, %c16_i32_68 : i32
      %112 = tpu.assume_multiple %111, 8 : i32
      %c2_i32_69 = arith.constant 2 : i32
      %113 = arith.muli %arg0, %c2_i32_69 : i32
      %c0_i32_70 = arith.constant 0 : i32
      %114 = tpu.memref_slice %arg2[%113, %112, %c0_i32_70] : memref<2x32x128xf32, #tpu.memory_space<any>> -> memref<2x32x128xf32, #tpu.memory_space<any>>
      %c0_i32_71 = arith.constant 0 : i32
      %c0_i32_72 = arith.constant 0 : i32
      %c0_i32_73 = arith.constant 0 : i32
      %115 = tpu.memref_slice %arg6[%0, %c0_i32_71, %c0_i32_72, %c0_i32_73] : memref<2x2x32x128xf32, #tpu.memory_space<vmem>> -> memref<1x2x32x128xf32, #tpu.memory_space<vmem>>
      %116 = tpu.memref_squeeze %115 : memref<1x2x32x128xf32, #tpu.memory_space<vmem>> -> memref<2x32x128xf32, #tpu.memory_space<vmem>>
      %117 = tpu.memref_slice %arg7[%0] : memref<2x!tpu.dma_semaphore, #tpu.memory_space<semaphore_mem>> -> memref<1x!tpu.dma_semaphore, #tpu.memory_space<semaphore_mem>>
      %118 = tpu.memref_squeeze %117 : memref<1x!tpu.dma_semaphore, #tpu.memory_space<semaphore_mem>> -> memref<!tpu.dma_semaphore, #tpu.memory_space<semaphore_mem>>
      tpu.enqueue_dma source(%114 : memref<2x32x128xf32, #tpu.memory_space<any>>) target(%116 : memref<2x32x128xf32, #tpu.memory_space<vmem>>) target_semaphore(%118 : memref<!tpu.dma_semaphore, #tpu.memory_space<semaphore_mem>>)
    } else {
    }
    %c16_i32 = arith.constant 16 : i32
    %4 = arith.muli %arg1, %c16_i32 : i32
    %5 = tpu.assume_multiple %4, 8 : i32
    %c2_i32_1 = arith.constant 2 : i32
    %6 = arith.muli %arg0, %c2_i32_1 : i32
    %c0_i32_2 = arith.constant 0 : i32
    %7 = tpu.memref_slice %arg2[%6, %5, %c0_i32_2] : memref<2x32x128xf32, #tpu.memory_space<any>> -> memref<2x32x128xf32, #tpu.memory_space<any>>
    %c0_i32_3 = arith.constant 0 : i32
    %c0_i32_4 = arith.constant 0 : i32
    %c0_i32_5 = arith.constant 0 : i32
    %8 = tpu.memref_slice %arg6[%0, %c0_i32_3, %c0_i32_4, %c0_i32_5] : memref<2x2x32x128xf32, #tpu.memory_space<vmem>> -> memref<1x2x32x128xf32, #tpu.memory_space<vmem>>
    %9 = tpu.memref_squeeze %8 : memref<1x2x32x128xf32, #tpu.memory_space<vmem>> -> memref<2x32x128xf32, #tpu.memory_space<vmem>>
    %10 = tpu.memref_slice %arg7[%0] : memref<2x!tpu.dma_semaphore, #tpu.memory_space<semaphore_mem>> -> memref<1x!tpu.dma_semaphore, #tpu.memory_space<semaphore_mem>>
    %11 = tpu.memref_squeeze %10 : memref<1x!tpu.dma_semaphore, #tpu.memory_space<semaphore_mem>> -> memref<!tpu.dma_semaphore, #tpu.memory_space<semaphore_mem>>
    tpu.wait_dma2 semaphore(%11 : memref<!tpu.dma_semaphore, #tpu.memory_space<semaphore_mem>>) src(%7 : memref<2x32x128xf32, #tpu.memory_space<any>>) dst(%9 : memref<2x32x128xf32, #tpu.memory_space<vmem>>)
    %c1_i32 = arith.constant 1 : i32
    %12 = arith.addi %arg1, %c1_i32 : i32
    %c1_i32_6 = arith.constant 1 : i32
    %13 = arith.cmpi slt, %12, %c1_i32_6 : i32
    %14 = arith.extui %13 : i1 to i32
    %c0_i32_7 = arith.constant 0 : i32
    %15 = arith.cmpi ne, %14, %c0_i32_7 : i32
    scf.if %15 {
      %c1_i32_68 = arith.constant 1 : i32
      %111 = arith.addi %arg1, %c1_i32_68 : i32
      %c1_i32_69 = arith.constant 1 : i32
      %112 = arith.subi %c1_i32_69, %0 : i32
      %c16_i32_70 = arith.constant 16 : i32
      %113 = arith.muli %111, %c16_i32_70 : i32
      %114 = tpu.assume_multiple %113, 8 : i32
      %c2_i32_71 = arith.constant 2 : i32
      %115 = arith.muli %arg0, %c2_i32_71 : i32
      %c0_i32_72 = arith.constant 0 : i32
      %116 = tpu.memref_slice %arg2[%115, %114, %c0_i32_72] : memref<2x32x128xf32, #tpu.memory_space<any>> -> memref<2x32x128xf32, #tpu.memory_space<any>>
      %c0_i32_73 = arith.constant 0 : i32
      %c0_i32_74 = arith.constant 0 : i32
      %c0_i32_75 = arith.constant 0 : i32
      %117 = tpu.memref_slice %arg6[%112, %c0_i32_73, %c0_i32_74, %c0_i32_75] : memref<2x2x32x128xf32, #tpu.memory_space<vmem>> -> memref<1x2x32x128xf32, #tpu.memory_space<vmem>>
      %118 = tpu.memref_squeeze %117 : memref<1x2x32x128xf32, #tpu.memory_space<vmem>> -> memref<2x32x128xf32, #tpu.memory_space<vmem>>
      %119 = tpu.memref_slice %arg7[%112] : memref<2x!tpu.dma_semaphore, #tpu.memory_space<semaphore_mem>> -> memref<1x!tpu.dma_semaphore, #tpu.memory_space<semaphore_mem>>
      %120 = tpu.memref_squeeze %119 : memref<1x!tpu.dma_semaphore, #tpu.memory_space<semaphore_mem>> -> memref<!tpu.dma_semaphore, #tpu.memory_space<semaphore_mem>>
      tpu.enqueue_dma source(%116 : memref<2x32x128xf32, #tpu.memory_space<any>>) target(%118 : memref<2x32x128xf32, #tpu.memory_space<vmem>>) target_semaphore(%120 : memref<!tpu.dma_semaphore, #tpu.memory_space<semaphore_mem>>)
    } else {
    }
    %16 = arith.index_cast %0 : i32 to index
    %c0 = arith.constant 0 : index
    %c0_8 = arith.constant 0 : index
    %c0_9 = arith.constant 0 : index
    %17 = vector.load %arg6[%16, %c0, %c0_8, %c0_9] : memref<2x2x32x128xf32, #tpu.memory_space<vmem>>, vector<1x2x32x128xf32>
    %18 = vector.shape_cast %17 : vector<1x2x32x128xf32> to vector<2x32x128xf32>
    %19 = vector.shape_cast %18 : vector<2x32x128xf32> to vector<64x128xf32>
    %c0_10 = arith.constant 0 : index
    %c0_11 = arith.constant 0 : index
    %20 = vector.load %arg4[%c0_10, %c0_11] : memref<8x128xf32, #tpu.memory_space<vmem>>, vector<8x128xf32>
    %21 = vector.extract_strided_slice %20 {offsets = [0, 0], sizes = [1, 128], strides = [1, 1]} : vector<8x128xf32> to vector<1x128xf32>
    %22 = vector.extract_strided_slice %20 {offsets = [1, 0], sizes = [1, 128], strides = [1, 1]} : vector<8x128xf32> to vector<1x128xf32>
    %23 = vector.extract_strided_slice %20 {offsets = [2, 0], sizes = [1, 128], strides = [1, 1]} : vector<8x128xf32> to vector<1x128xf32>
    %24 = vector.extract_strided_slice %20 {offsets = [3, 0], sizes = [1, 128], strides = [1, 1]} : vector<8x128xf32> to vector<1x128xf32>
    %25 = tpu.iota {dimensions = array<i32: 0>} : vector<32x1xi32>
    %c16_i32_12 = arith.constant 16 : i32
    %26 = arith.muli %arg1, %c16_i32_12 : i32
    %c8_i32 = arith.constant 8 : i32
    %27 = arith.subi %26, %c8_i32 : i32
    %28 = vector.broadcast %27 : i32 to vector<32x1xi32>
    %29 = arith.addi %28, %25 : vector<32x1xi32>
    %c0_i32_13 = arith.constant 0 : i32
    %30 = vector.broadcast %c0_i32_13 : i32 to vector<32x1xi32>
    %31 = arith.cmpi sge, %29, %30 : vector<32x1xi32>
    %c16_i32_14 = arith.constant 16 : i32
    %32 = vector.broadcast %c16_i32_14 : i32 to vector<32x1xi32>
    %33 = arith.cmpi slt, %29, %32 : vector<32x1xi32>
    %34 = arith.andi %31, %33 : vector<32x1xi1>
    %35 = arith.extui %34 : vector<32x1xi1> to vector<32x1xi32>
    %36 = arith.sitofp %35 : vector<32x1xi32> to vector<32x1xf32>
    %37 = tpu.concatenate %36, %36 in 0 : vector<32x1xf32>, vector<32x1xf32> -> vector<64x1xf32>
    %38 = vector.broadcast %21 : vector<1x128xf32> to vector<64x128xf32>
    %39 = arith.mulf %19, %38 : vector<64x128xf32>
    %40 = vector.broadcast %22 : vector<1x128xf32> to vector<64x128xf32>
    %41 = arith.addf %39, %40 : vector<64x128xf32>
    %cst = arith.constant 0.000000e+00 : f32
    %42 = vector.broadcast %cst : f32 to vector<64x128xf32>
    %43 = arith.maximumf %41, %42 : vector<64x128xf32>
    %44 = vector.broadcast %37 : vector<64x1xf32> to vector<64x128xf32>
    %45 = arith.mulf %43, %44 : vector<64x128xf32>
    %c1_i32_15 = arith.constant 1 : i32
    %46 = tpu.dynamic_rotate %45 by %c1_i32_15 dim 0 : vector<64x128xf32>, i32 -> vector<64x128xf32>
    %47 = arith.truncf %46 : vector<64x128xf32> to vector<64x128xbf16>
    %c0_16 = arith.constant 0 : index
    %c0_17 = arith.constant 0 : index
    %c0_18 = arith.constant 0 : index
    %c0_19 = arith.constant 0 : index
    %48 = vector.load %arg3[%c0_16, %c0_17, %c0_18, %c0_19] : memref<3x3x128x128xbf16, #tpu.memory_space<vmem>>, vector<1x1x128x128xbf16>
    %49 = vector.shape_cast %48 : vector<1x1x128x128xbf16> to vector<128x128xbf16>
    %cst_20 = arith.constant dense<0.000000e+00> : vector<64x128xf32>
    %50 = tpu.matmul %47, %49, %cst_20 {dimension_numbers = #tpu.dot_dimension_numbers<[1], [0], [0], [1], [0, 0, 1, 1], [], []>} : vector<64x128xbf16>, vector<128x128xbf16>, vector<64x128xf32> -> vector<64x128xf32>
    %51 = arith.truncf %45 : vector<64x128xf32> to vector<64x128xbf16>
    %c0_21 = arith.constant 0 : index
    %c1 = arith.constant 1 : index
    %c0_22 = arith.constant 0 : index
    %c0_23 = arith.constant 0 : index
    %52 = vector.load %arg3[%c0_21, %c1, %c0_22, %c0_23] : memref<3x3x128x128xbf16, #tpu.memory_space<vmem>>, vector<1x1x128x128xbf16>
    %53 = vector.shape_cast %52 : vector<1x1x128x128xbf16> to vector<128x128xbf16>
    %cst_24 = arith.constant dense<0.000000e+00> : vector<64x128xf32>
    %54 = tpu.matmul %51, %53, %cst_24 {dimension_numbers = #tpu.dot_dimension_numbers<[1], [0], [0], [1], [0, 0, 1, 1], [], []>} : vector<64x128xbf16>, vector<128x128xbf16>, vector<64x128xf32> -> vector<64x128xf32>
    %55 = arith.addf %50, %54 : vector<64x128xf32>
    %c63_i32 = arith.constant 63 : i32
    %56 = tpu.dynamic_rotate %45 by %c63_i32 dim 0 : vector<64x128xf32>, i32 -> vector<64x128xf32>
    %57 = arith.truncf %56 : vector<64x128xf32> to vector<64x128xbf16>
    %c0_25 = arith.constant 0 : index
    %c2 = arith.constant 2 : index
    %c0_26 = arith.constant 0 : index
    %c0_27 = arith.constant 0 : index
    %58 = vector.load %arg3[%c0_25, %c2, %c0_26, %c0_27] : memref<3x3x128x128xbf16, #tpu.memory_space<vmem>>, vector<1x1x128x128xbf16>
    %59 = vector.shape_cast %58 : vector<1x1x128x128xbf16> to vector<128x128xbf16>
    %cst_28 = arith.constant dense<0.000000e+00> : vector<64x128xf32>
    %60 = tpu.matmul %57, %59, %cst_28 {dimension_numbers = #tpu.dot_dimension_numbers<[1], [0], [0], [1], [0, 0, 1, 1], [], []>} : vector<64x128xbf16>, vector<128x128xbf16>, vector<64x128xf32> -> vector<64x128xf32>
    %61 = arith.addf %55, %60 : vector<64x128xf32>
    %62 = vector.broadcast %23 : vector<1x128xf32> to vector<64x128xf32>
    %63 = arith.addf %61, %62 : vector<64x128xf32>
    %cst_29 = arith.constant 0.000000e+00 : f32
    %64 = vector.broadcast %cst_29 : f32 to vector<64x128xf32>
    %65 = arith.maximumf %63, %64 : vector<64x128xf32>
    %66 = vector.broadcast %37 : vector<64x1xf32> to vector<64x128xf32>
    %67 = arith.mulf %65, %66 : vector<64x128xf32>
    %c1_i32_30 = arith.constant 1 : i32
    %68 = tpu.dynamic_rotate %67 by %c1_i32_30 dim 0 : vector<64x128xf32>, i32 -> vector<64x128xf32>
    %69 = arith.truncf %68 : vector<64x128xf32> to vector<64x128xbf16>
    %c1_31 = arith.constant 1 : index
    %c0_32 = arith.constant 0 : index
    %c0_33 = arith.constant 0 : index
    %c0_34 = arith.constant 0 : index
    %70 = vector.load %arg3[%c1_31, %c0_32, %c0_33, %c0_34] : memref<3x3x128x128xbf16, #tpu.memory_space<vmem>>, vector<1x1x128x128xbf16>
    %71 = vector.shape_cast %70 : vector<1x1x128x128xbf16> to vector<128x128xbf16>
    %cst_35 = arith.constant dense<0.000000e+00> : vector<64x128xf32>
    %72 = tpu.matmul %69, %71, %cst_35 {dimension_numbers = #tpu.dot_dimension_numbers<[1], [0], [0], [1], [0, 0, 1, 1], [], []>} : vector<64x128xbf16>, vector<128x128xbf16>, vector<64x128xf32> -> vector<64x128xf32>
    %73 = arith.truncf %67 : vector<64x128xf32> to vector<64x128xbf16>
    %c1_36 = arith.constant 1 : index
    %c1_37 = arith.constant 1 : index
    %c0_38 = arith.constant 0 : index
    %c0_39 = arith.constant 0 : index
    %74 = vector.load %arg3[%c1_36, %c1_37, %c0_38, %c0_39] : memref<3x3x128x128xbf16, #tpu.memory_space<vmem>>, vector<1x1x128x128xbf16>
    %75 = vector.shape_cast %74 : vector<1x1x128x128xbf16> to vector<128x128xbf16>
    %cst_40 = arith.constant dense<0.000000e+00> : vector<64x128xf32>
    %76 = tpu.matmul %73, %75, %cst_40 {dimension_numbers = #tpu.dot_dimension_numbers<[1], [0], [0], [1], [0, 0, 1, 1], [], []>} : vector<64x128xbf16>, vector<128x128xbf16>, vector<64x128xf32> -> vector<64x128xf32>
    %77 = arith.addf %72, %76 : vector<64x128xf32>
    %c63_i32_41 = arith.constant 63 : i32
    %78 = tpu.dynamic_rotate %67 by %c63_i32_41 dim 0 : vector<64x128xf32>, i32 -> vector<64x128xf32>
    %79 = arith.truncf %78 : vector<64x128xf32> to vector<64x128xbf16>
    %c1_42 = arith.constant 1 : index
    %c2_43 = arith.constant 2 : index
    %c0_44 = arith.constant 0 : index
    %c0_45 = arith.constant 0 : index
    %80 = vector.load %arg3[%c1_42, %c2_43, %c0_44, %c0_45] : memref<3x3x128x128xbf16, #tpu.memory_space<vmem>>, vector<1x1x128x128xbf16>
    %81 = vector.shape_cast %80 : vector<1x1x128x128xbf16> to vector<128x128xbf16>
    %cst_46 = arith.constant dense<0.000000e+00> : vector<64x128xf32>
    %82 = tpu.matmul %79, %81, %cst_46 {dimension_numbers = #tpu.dot_dimension_numbers<[1], [0], [0], [1], [0, 0, 1, 1], [], []>} : vector<64x128xbf16>, vector<128x128xbf16>, vector<64x128xf32> -> vector<64x128xf32>
    %83 = arith.addf %77, %82 : vector<64x128xf32>
    %84 = vector.broadcast %24 : vector<1x128xf32> to vector<64x128xf32>
    %85 = arith.addf %83, %84 : vector<64x128xf32>
    %cst_47 = arith.constant 0.000000e+00 : f32
    %86 = vector.broadcast %cst_47 : f32 to vector<64x128xf32>
    %87 = arith.maximumf %85, %86 : vector<64x128xf32>
    %88 = vector.broadcast %37 : vector<64x1xf32> to vector<64x128xf32>
    %89 = arith.mulf %87, %88 : vector<64x128xf32>
    %c1_i32_48 = arith.constant 1 : i32
    %90 = tpu.dynamic_rotate %89 by %c1_i32_48 dim 0 : vector<64x128xf32>, i32 -> vector<64x128xf32>
    %91 = arith.truncf %90 : vector<64x128xf32> to vector<64x128xbf16>
    %c2_49 = arith.constant 2 : index
    %c0_50 = arith.constant 0 : index
    %c0_51 = arith.constant 0 : index
    %c0_52 = arith.constant 0 : index
    %92 = vector.load %arg3[%c2_49, %c0_50, %c0_51, %c0_52] : memref<3x3x128x128xbf16, #tpu.memory_space<vmem>>, vector<1x1x128x128xbf16>
    %93 = vector.shape_cast %92 : vector<1x1x128x128xbf16> to vector<128x128xbf16>
    %cst_53 = arith.constant dense<0.000000e+00> : vector<64x128xf32>
    %94 = tpu.matmul %91, %93, %cst_53 {dimension_numbers = #tpu.dot_dimension_numbers<[1], [0], [0], [1], [0, 0, 1, 1], [], []>} : vector<64x128xbf16>, vector<128x128xbf16>, vector<64x128xf32> -> vector<64x128xf32>
    %95 = arith.truncf %89 : vector<64x128xf32> to vector<64x128xbf16>
    %c2_54 = arith.constant 2 : index
    %c1_55 = arith.constant 1 : index
    %c0_56 = arith.constant 0 : index
    %c0_57 = arith.constant 0 : index
    %96 = vector.load %arg3[%c2_54, %c1_55, %c0_56, %c0_57] : memref<3x3x128x128xbf16, #tpu.memory_space<vmem>>, vector<1x1x128x128xbf16>
    %97 = vector.shape_cast %96 : vector<1x1x128x128xbf16> to vector<128x128xbf16>
    %cst_58 = arith.constant dense<0.000000e+00> : vector<64x128xf32>
    %98 = tpu.matmul %95, %97, %cst_58 {dimension_numbers = #tpu.dot_dimension_numbers<[1], [0], [0], [1], [0, 0, 1, 1], [], []>} : vector<64x128xbf16>, vector<128x128xbf16>, vector<64x128xf32> -> vector<64x128xf32>
    %99 = arith.addf %94, %98 : vector<64x128xf32>
    %c63_i32_59 = arith.constant 63 : i32
    %100 = tpu.dynamic_rotate %89 by %c63_i32_59 dim 0 : vector<64x128xf32>, i32 -> vector<64x128xf32>
    %101 = arith.truncf %100 : vector<64x128xf32> to vector<64x128xbf16>
    %c2_60 = arith.constant 2 : index
    %c2_61 = arith.constant 2 : index
    %c0_62 = arith.constant 0 : index
    %c0_63 = arith.constant 0 : index
    %102 = vector.load %arg3[%c2_60, %c2_61, %c0_62, %c0_63] : memref<3x3x128x128xbf16, #tpu.memory_space<vmem>>, vector<1x1x128x128xbf16>
    %103 = vector.shape_cast %102 : vector<1x1x128x128xbf16> to vector<128x128xbf16>
    %cst_64 = arith.constant dense<0.000000e+00> : vector<64x128xf32>
    %104 = tpu.matmul %101, %103, %cst_64 {dimension_numbers = #tpu.dot_dimension_numbers<[1], [0], [0], [1], [0, 0, 1, 1], [], []>} : vector<64x128xbf16>, vector<128x128xbf16>, vector<64x128xf32> -> vector<64x128xf32>
    %105 = arith.addf %99, %104 : vector<64x128xf32>
    %106 = vector.shape_cast %105 : vector<64x128xf32> to vector<2x32x128xf32>
    %107 = vector.extract_strided_slice %106 {offsets = [0, 8, 0], sizes = [2, 16, 128], strides = [1, 1, 1]} : vector<2x32x128xf32> to vector<2x16x128xf32>
    %108 = vector.extract_strided_slice %18 {offsets = [0, 8, 0], sizes = [2, 16, 128], strides = [1, 1, 1]} : vector<2x32x128xf32> to vector<2x16x128xf32>
    %109 = arith.addf %107, %108 : vector<2x16x128xf32>
    %c0_65 = arith.constant 0 : index
    %c0_66 = arith.constant 0 : index
    %c0_67 = arith.constant 0 : index
    %110 = vector.load %arg5[%c0_65, %c0_66, %c0_67] : memref<2x16x128xf32, #tpu.memory_space<vmem>>, vector<2x16x128xf32>
    tpu.vector_store %arg5[%c0_65, %c0_66, %c0_67], %109 {strides = array<i32>} : memref<2x16x128xf32, #tpu.memory_space<vmem>>, vector<2x16x128xf32>,
    return
  }
  func.func @transform_1(%arg0: i32, %arg1: i32) -> (i32, i32, i32, i32) {
    %c0_i32 = arith.constant 0 : i32
    %c0_i32_0 = arith.constant 0 : i32
    %c0_i32_1 = arith.constant 0 : i32
    %c0_i32_2 = arith.constant 0 : i32
    %c0_i32_3 = arith.constant 0 : i32
    return %c0_i32, %c0_i32_0, %c0_i32_1, %c0_i32_2 : i32, i32, i32, i32
  }
  func.func @transform_2(%arg0: i32, %arg1: i32) -> (i32, i32) {
    %c0_i32 = arith.constant 0 : i32
    %c0_i32_0 = arith.constant 0 : i32
    %c0_i32_1 = arith.constant 0 : i32
    return %c0_i32, %c0_i32_0 : i32, i32
  }
  func.func @transform_3(%arg0: i32, %arg1: i32) -> (i32, i32, i32) {
    %c0_i32 = arith.constant 0 : i32
    %c0_i32_0 = arith.constant 0 : i32
    return %arg0, %arg1, %c0_i32 : i32, i32, i32
  }
}

</mosaic_0001>

<bundles_post_ra>
// kernel: tpu_custom_call.1
= control target key start
LH: loop header
LB: loop body
LE: loop exit
PB: predicated region body
PF: predicated region fallthrough
CT: control target
= control target key end

     0   :  { %8 = vsyncpa [#allocation5], 0  ;;  %s2565_s0 = inlined_call_operand.hbm [shape: f32[2,32,128], index: 0, kind: input, shape index: {}]   ;;  %s2566_s1 = inlined_call_operand.hbm [shape: bf16[3,3,128,128], index: 1, kind: input, shape index: {}]   ;;  %s2567_s2 = inlined_call_operand.hbm [shape: f32[8,128], index: 2, kind: input, shape index: {}]   ;;  %s2568_s3 = inlined_call_operand.hbm [shape: f32[2,16,128], index: 3, kind: output, shape index: {}]  }
   0x1   :  { %9 = vsyncpa [#allocation8], 0 }
   0x2   :  { %10 = vsyncpa [#allocation6], 0  ;;  %s2244_s12 = smov [#allocation4]   ;;  %s2148_s16 = scalar_lea.hbm %s2566_s1, 9216 }
   0x3   :  { %s16_s13 = sshll.u32 %s2244_s12, 4  ;;  %p2149_p0 = scmp.ne.s32.totalorder %s2566_s1, %s2148_s16  ;;  %s17_s13 = int_to_ptr.vmem [resolvable:$true] %s16_s13 }
   0x4   :  { %p2152_p1 = scmp.lt.u32.totalorder %s2148_s16, %s2566_s1 }
   0x6   :  { %p2154_p2 = pnand %p2152_p1, %p2149_p0 }
   0x8   :  { %2157 = shalt.err (!%p2154_p2)
}
   0x9   :  { %s2158_s21 = scalar_lea.vmem %s17_s13, 9216  ;;  %p2163_p4 = scmp.lt.s32.totalorder %s17_s13, %s17_s13 }
   0xa   :  { %p2159_p3 = scmp.ne.s32.totalorder %s17_s13, %s2158_s21  ;;  %p2164_p5 = scmp.lt.s32.totalorder %s2158_s21, %s2158_s21 }
   0xc   :  { %p2165_p6 = por %p2164_p5, %p2163_p4 }
   0xe   :  { %p2166_p7 = pnand %p2165_p6, %p2159_p3 }
  0x10   :  { %2169 = shalt.err (!%p2166_p7)
}
  0x11   :  { %s2245_s22 = smov 64   ;;  %s2246_s23 = smov 4  }
  0x12   :  { %22 = dma.hbm_to_vmem [thread:$0]  %s2566_s1, 9216, %s17_s13, [#allocation5], %s2245_s22, %s2245_s22, %s2246_s23  }
  0x13   :  { %s2247_s26 = smov [#allocation7]   ;;  %s2170_s30 = scalar_lea.hbm %s2567_s2, 128 }
  0x14   :  { %s29_s27 = sshll.u32 %s2247_s26, 4  ;;  %p2171_p8 = scmp.ne.s32.totalorder %s2567_s2, %s2170_s30  ;;  %s30_s27 = int_to_ptr.vmem [resolvable:$true] %s29_s27 }
  0x15   :  { %p2174_p9 = scmp.lt.u32.totalorder %s2170_s30, %s2567_s2 }
  0x17   :  { %p2176_p10 = pnand %p2174_p9, %p2171_p8 }
  0x19   :  { %2179 = shalt.err (!%p2176_p10)
}
  0x1a   :  { %s2180_s8 = scalar_lea.vmem %s30_s27, 128  ;;  %p2185_p12 = scmp.lt.s32.totalorder %s30_s27, %s30_s27 }
  0x1b   :  { %p2181_p11 = scmp.ne.s32.totalorder %s30_s27, %s2180_s8  ;;  %p2186_p13 = scmp.lt.s32.totalorder %s2180_s8, %s2180_s8 }
  0x1d   :  { %p2187_p0 = por %p2186_p13, %p2185_p12 }
  0x1f   :  { %p2188_p1 = pnand %p2187_p0, %p2181_p11 }
  0x21   :  { %2191 = shalt.err (!%p2188_p1)
}
  0x22   :  { %32 = dma.hbm_to_vmem [thread:$0]  %s2567_s2, 128, %s30_s27, [#allocation8]  }
  0x23   :  { %2236 = dma.done.wait [#allocation5], 9216  }
  0x24   :  { %2237 = vsyncadd [#allocation5], 4294958080 }
  0x25   :  { %2238 = dma.done.wait [#allocation8], 128  }
  0x26   :  { %2239 = vsyncadd [#allocation8], 4294967168  ;;  %s2248_s10 = smov [#allocation2]   ;;  %s2192_s14 = scalar_lea.hbm %s2565_s0, 1024 }
  0x27   :  { %s61_s11 = sshll.u32 %s2248_s10, 4  ;;  %p2193_p2 = scmp.ne.s32.totalorder %s2565_s0, %s2192_s14  ;;  %s62_s11 = int_to_ptr.vmem [resolvable:$true] %s61_s11 }
  0x28   :  { %p2196_p3 = scmp.lt.u32.totalorder %s2192_s14, %s2565_s0 }
  0x2a   :  { %p2198_p4 = pnand %p2196_p3, %p2193_p2 }
  0x2c   :  { %2201 = shalt.err (!%p2198_p4)  }
  0x2d   :  { %s2202_s2 = scalar_lea.vmem %s62_s11, 1024  ;;  %s2206_s19 = scalar_lea.vmem %s62_s11, 2048 }
  0x2e   :  { %p2203_p5 = scmp.ne.s32.totalorder %s62_s11, %s2202_s2  ;;  %p2207_p6 = scmp.lt.s32.totalorder %s62_s11, %s62_s11 }
  0x2f   :  { %p2208_p7 = scmp.lt.s32.totalorder %s2206_s19, %s2202_s2 }
  0x31   :  { %p2209_p8 = por %p2208_p7, %p2207_p6 }
  0x33   :  { %p2210_p9 = pnand %p2209_p8, %p2203_p5 }
  0x35   :  { %2213 = shalt.err (!%p2210_p9)  }
  0x36   :  { %64 = dma.hbm_to_vmem [thread:$0]  %s2565_s0, 1024, %s62_s11, [#allocation3] }
  0x37   :  { %2240 = dma.done.wait [#allocation3], 1024 }
  0x38   :  { %2241 = vsyncadd [#allocation3], 4294966272  ;;  %v2249_v0 = vmov 0   ;;  %v2250_v1 = vmov 1.0   ;;  %v2251_v2 = vmov 1.0|0.0   ;;  %v2076_v3 = vld [vmem:[#allocation4 + $0x40] sm:$0xff]   ;;  %v107_v17 = vlaneseq }
  0x39   :  { %2065 = vset.pattern.permute.xlu0 %v2249_v0  ;;  %v2077_v4 = vld [vmem:[#allocation4 + $0x48] sm:$0xff]   ;;  %1790 = vmatprep.subr.bf16.mxu0 %v2076_v3  ;;  %v2078_v5 = vld [vmem:[#allocation4 + $0x50] sm:$0xff]   ;;  %v2079_v6 = vld [vmem:[#allocation4 + $0x58] sm:$0xff]   ;;  %s2252_s0 = smov [#allocation9]  }
  0x3a   :  { %2067 = vperm.xlu0 %2065, %v2250_v1   ;;  %1791 = vmatpush3.bf16.msra.mxu0 %v2076_v3  ;;  %v2080_v7 = vld [vmem:[#allocation4 + $0x60] sm:$0xff]   ;;  %v2081_v8 = vld [vmem:[#allocation4 + $0x68] sm:$0xff]   ;;  %v2082_v9 = vld [vmem:[#allocation4 + $0x70] sm:$0xff]   ;;  %v2314_v18 = vshrl.u32 %v107_v17, 7  ;;  %s1578_s22 = sshll.u32 %s2252_s0, 4  ;;  %s1579_s22 = int_to_ptr.vmem [resolvable:$true] %s1578_s22 }
  0x3b   :  { %1792 = vmatprep.subr.bf16.mxu0 %v2077_v4  ;;  %v2083_v10 = vld [vmem:[#allocation4 + $0x78] sm:$0xff]   ;;  %v2311_v11 = vld [vmem:[#allocation4] sm:$0xff]   ;;  %v2101_v13 = vld [vmem:[#allocation4 + $0x108] sm:$0xff]   ;;  %s2214_s23 = scalar_lea.vmem %s1579_s22, 512  ;;  %p2219_p11 = scmp.lt.s32.totalorder %s1579_s22, %s1579_s22 }
  0x3c   :  { %v2100_v12 = vld [vmem:[#allocation4 + $0x100] sm:$0xff]   ;;  %v2102_v14 = vld [vmem:[#allocation4 + $0x110] sm:$0xff]   ;;  %v2103_v15 = vld [vmem:[#allocation4 + $0x118] sm:$0xff]   ;;  %v140_v19 = vsub.s32 0, %v2314_v18  ;;  %v152_v22 = vsub.s32 1, %v2314_v18  ;;  %vm206_vm0 = vcmp.lt.s32.totalorder %v2314_v18, 1  ;;  %p2215_p10 = scmp.ne.s32.totalorder %s1579_s22, %s2214_s23  ;;  %p2220_p12 = scmp.lt.s32.totalorder %s2214_s23, %s2214_s23 }
  0x3d   :  { %1862 = vmatprep.subr.bf16.mxu1 %v2100_v12  ;;  %v2104_v16 = vld [vmem:[#allocation4 + $0x120] sm:$0xff]   ;;  %v2321_v24 = vld [vmem:[#allocation2 + $0x8] sm:$0xff]  ;;  %v2327_v30 = vld [vmem:[#allocation2 + $0x10] sm:$0xff]  ;;  %vm490_vm1 = vcmp.lt.s32.totalorder %v2314_v18, 7 }
  0x3e   :  { %2072 = vperm.xlu0 %2065, %v2251_v2   ;;  %1793 = vmatpush3.bf16.msra.mxu0 %v2077_v4  ;;  %v2317_v20 = vld [vmem:[#allocation7] sm:$0xff]  ;;  %v2325_v29 = vld [vmem:[#allocation2 + $0x28] sm:$0xff]  ;;  %v101_v31 = vld [vmem:[#allocation2 + $0x18] sm:$0xff]  ;;  %p2221_p13 = por %p2220_p12, %p2219_p11 }
  0x3f   :  { %1794 = vmatprep.subr.bf16.mxu0 %v2078_v5  ;;  %1863 = vmatpush3.bf16.msra.mxu1 %v2100_v12  ;;  %v141_v21 = vrot.slane %v2317_v20, %v140_v19  ;;  %v98_v23 = vld [vmem:[#allocation2] sm:$0xff]  ;;  %v153_v27 = vrot.slane %v2317_v20, %v152_v22  ;;  %v105_v32 = vld [vmem:[#allocation2 + $0x38] sm:$0xff]  ;;  %v2331_v42 = vld [vmem:[#allocation2 + $0x30] sm:$0xff] }
  0x40   :  { %1864 = vmatprep.subr.bf16.mxu1 %v2101_v13  ;;  %v102_v28 = vld [vmem:[#allocation2 + $0x20] sm:$0xff]  ;;  %v2087_v17 = vld [vmem:[#allocation4 + $0x18] sm:$0xff]   ;;  %v2089_v22 = vld [vmem:[#allocation4 + $0x28] sm:$0xff]   ;;  %p2222_p0 = pnand %p2221_p13, %p2215_p10 }
  0x41   :  { %v142_v25 = vmul.f32 %v141_v21, %v98_v23  ;;  %v143_v26 = vmul.f32 %v141_v21, %v2321_v24  ;;  %v146_v33 = vmul.f32 %v141_v21, %v102_v28  ;;  %v147_v34 = vmul.f32 %v141_v21, %v2325_v29  ;;  %v2090_v23 = vld [vmem:[#allocation4 + $0x30] sm:$0xff]   ;;  %v2092_v28 = vld [vmem:[#allocation4 + $0x80] sm:$0xff]  }
  0x42   :  { %1795 = vmatpush3.bf16.msra.mxu0 %v2078_v5  ;;  %v144_v37 = vmul.f32 %v141_v21, %v2327_v30  ;;  %v145_v38 = vmul.f32 %v141_v21, %v101_v31  ;;  %v149_v39 = vmul.f32 %v141_v21, %v105_v32  ;;  %v148_v51 = vmul.f32 %v141_v21, %v2331_v42  ;;  %v2088_v21 = vld [vmem:[#allocation4 + $0x20] sm:$0xff]  }
  0x43   :  { %1796 = vmatprep.subr.bf16.mxu0 %v2079_v6  ;;  %1865 = vmatpush3.bf16.msra.mxu1 %v2101_v13  ;;  %v154_v35 = vadd.f32 %v153_v27, %v142_v25  ;;  %v155_v36 = vadd.f32 %v153_v27, %v143_v26  ;;  %v158_v40 = vadd.f32 %v153_v27, %v146_v33  ;;  %v2086_v13 = vld [vmem:[#allocation4 + $0x10] sm:$0xff]   ;;  %v2091_v25 = vld [vmem:[#allocation4 + $0x38] sm:$0xff]  }
  0x44   :  { %1866 = vmatprep.subr.bf16.mxu1 %v2102_v14  ;;  %v159_v41 = vadd.f32 %v153_v27, %v147_v34  ;;  %v156_v45 = vadd.f32 %v153_v27, %v144_v37  ;;  %v157_v46 = vadd.f32 %v153_v27, %v145_v38  ;;  %v161_v48 = vadd.f32 %v153_v27, %v149_v39  ;;  %v2093_v38 = vld [vmem:[#allocation4 + $0x88] sm:$0xff]  }
  0x45   :  { %v162_v43 = vmax.f32 %v154_v35, 0.0  ;;  %v163_v44 = vmax.f32 %v155_v36, 0.0  ;;  %v166_v52 = vmax.f32 %v158_v40, 0.0  ;;  %v160_v62 = vadd.f32 %v153_v27, %v148_v51 }
  0x46   :  { %1797 = vmatpush3.bf16.msra.mxu0 %v2079_v6  ;;  %v167_v53 = vmax.f32 %v159_v41, 0.0  ;;  %v164_v56 = vmax.f32 %v156_v45, 0.0  ;;  %v165_v57 = vmax.f32 %v157_v46, 0.0  ;;  %v169_v59 = vmax.f32 %v161_v48, 0.0  ;;  %v2085_v6 = vld [vmem:[#allocation4 + $0x8] sm:$0xff]   ;;  %v2094_v45 = vld [vmem:[#allocation4 + $0x90] sm:$0xff]  }
  0x47   :  { %1798 = vmatprep.subr.bf16.mxu0 %v2080_v7  ;;  %1867 = vmatpush3.bf16.msra.mxu1 %v2102_v14 }
  0x48   :  { %1868 = vmatprep.subr.bf16.mxu1 %v2103_v15 }
  0x4a   :  { %1799 = vmatpush3.bf16.msra.mxu0 %v2080_v7  ;;  %v168_v7 = vmax.f32 %v160_v62, 0.0 }
  0x4b   :  { %1800 = vmatprep.subr.bf16.mxu0 %v2081_v8  ;;  %1869 = vmatpush3.bf16.msra.mxu1 %v2103_v15 }
  0x4c   :  { %1870 = vmatprep.subr.bf16.mxu1 %v2104_v16 }
  0x4e   :  { %1801 = vmatpush3.bf16.msra.mxu0 %v2081_v8 }
  0x4f   :  { %1802 = vmatprep.subr.bf16.mxu0 %v2082_v9  ;;  %1871 = vmatpush3.bf16.msra.mxu1 %v2104_v16 }
  0x52   :  { %1803 = vmatpush3.bf16.msra.mxu0 %v2082_v9 }
  0x53   :  { %1804 = vmatprep.subr.bf16.mxu0 %v2083_v10 }
  0x56   :  { %1805 = vmatpush3.bf16.msra.mxu0 %v2083_v10 }
  0x57   :  { %1814 = vmatprep.subr.bf16.mxu0 %v2311_v11 }
  0xb9   :  { %v2068_v47 = vpop.permute.xlu0 %2067 }
  0xba   :  { %v2333_v49 = vunpack.i.h.bf16 %v2068_v47  ;;  %v2335_v50 = vunpack.i.l.bf16 %v2068_v47 }
  0xbc   :  { %v2339_v54 = vmul.f32 %v2335_v50, %v162_v43  ;;  %v2342_v55 = vmul.f32 %v2333_v49, %v163_v44  ;;  %v2351_v0 = vmul.f32 %v2335_v50, %v166_v52  ;;  %v2354_v1 = vmul.f32 %v2333_v49, %v167_v53  ;;  %v2095_v53 = vld [vmem:[#allocation4 + $0x98] sm:$0xff]  }
  0xbd   :  { %v2073_v58 = vpop.permute.xlu0 %2072 }
  0xbe   :  { %v2344_v60 = vunpack.i.h.bf16 %v2073_v58  ;;  %v2346_v61 = vunpack.i.l.bf16 %v2073_v58  ;;  %v235_v63 = vpack.c.bf16 %v2342_v55, %v2339_v54  ;;  %v237_v8 = vpack.c.bf16 %v2354_v1, %v2351_v0  ;;  %v2099_v58 = vld [vmem:[#allocation4 + $0xb8] sm:$0xff]  }
  0xbf   :  { %v198_v10 = vrot.slane %v2339_v54, 7  ;;  %v199_v12 = vrot.slane %v2342_v55, 7  ;;  %v202_v31 = vrot.slane %v2351_v0, 7  ;;  %v203_v32 = vrot.slane %v2354_v1, 7 }
  0xc0   :  { %v2357_v2 = vmul.f32 %v2346_v61, %v164_v56  ;;  %v2360_v3 = vmul.f32 %v2344_v60, %v165_v57  ;;  %1806 = vmatprep.mubr.bf16.mxu0 %v235_v63  ;;  %v2363_v4 = vmul.f32 %v2344_v60, %v169_v59  ;;  %v2374_v14 = vmul.f32 %v2346_v61, %v168_v7  ;;  %v2097_v56 = vld [vmem:[#allocation4 + $0xa8] sm:$0xff]   ;;  %v2098_v57 = vld [vmem:[#allocation4 + $0xb0] sm:$0xff]  }
  0xc1   :  { %v213_v16 = vsel %vm206_vm0, %v198_v10, %v199_v12  ;;  %v209_v37 = vsel %vm206_vm0, %v202_v31, %v203_v32  ;;  %v482_v43 = vrot.slane %v2339_v54, 1  ;;  %v483_v44 = vrot.slane %v2342_v55, 1  ;;  %v2096_v55 = vld [vmem:[#allocation4 + $0xa0] sm:$0xff]  }
  0xc2   :  { %v236_v5 = vpack.c.bf16 %v2360_v3, %v2357_v2  ;;  %v205_v9 = vrot.slane %v2363_v4, 7  ;;  %v200_v26 = vrot.slane %v2357_v2, 7  ;;  %v201_v27 = vrot.slane %v2360_v3, 7 }
  0xc3   :  { %v204_v40 = vrot.slane %v2374_v14, 7  ;;  %v484_v41 = vrot.slane %v2357_v2, 1  ;;  %v497_v52 = vsel %vm490_vm1, %v482_v43, %v483_v44  ;;  %v485_v59 = vrot.slane %v2360_v3, 1 }
  0xc4   :  { %1807 = vmatmul.mubr.bf16.vlgmr.msra.gmra.mrb[0].mxu0 %v236_v5  ;;  %v214_v15 = vsel %vm206_vm0, %v205_v9, %v198_v10  ;;  %v211_v33 = vsel %vm206_vm0, %v200_v26, %v201_v27  ;;  %v212_v34 = vsel %vm206_vm0, %v199_v12, %v200_v26  ;;  %v210_v35 = vsel %vm206_vm0, %v201_v27, %v202_v31 }
  0xc5   :  { %1815 = vmatpush3.bf16.msra.mxu0 %v2311_v11  ;;  %1810 = vmatprep.mubr.bf16.mxu0 %v237_v8  ;;  %v238_v11 = vpack.c.bf16 %v2363_v4, %v2374_v14  ;;  %v215_v19 = vpack.c.bf16 %v213_v16, %v214_v15  ;;  %v216_v36 = vpack.c.bf16 %v211_v33, %v212_v34  ;;  %v488_v62 = vrot.slane %v2374_v14, 1  ;;  %v2106_v14 = vld [vmem:[#allocation4 + $0x130] sm:$0xff]   ;;  %v2107_v15 = vld [vmem:[#allocation4 + $0x138] sm:$0xff]   ;;  %v2125_v16 = vld [vmem:[#allocation4 + $0x1c8] sm:$0xff]  }
  0xc6   :  { %1816 = vmatprep.subr.bf16.mxu0 %v2085_v6  ;;  %v217_v39 = vpack.c.bf16 %v209_v37, %v210_v35  ;;  %v207_v46 = vsel %vm206_vm0, %v204_v40, %v205_v9  ;;  %v208_v47 = vsel %vm206_vm0, %v203_v32, %v204_v40  ;;  %v496_v48 = vsel %vm490_vm1, %v483_v44, %v484_v41 }
  0xc7   :  { %v218_v51 = vpack.c.bf16 %v207_v46, %v208_v47  ;;  %v499_v54 = vpack.c.bf16 %v496_v48, %v497_v52  ;;  %v486_v63 = vrot.slane %v2351_v0, 1  ;;  %v487_v2 = vrot.slane %v2354_v1, 1 }
  0xc8   :  { %v489_v0 = vrot.slane %v2363_v4, 1  ;;  %v2425_v4 = vld [vmem:[#allocation4 + $0xc0] sm:$0xff]  }
  0xc9   :  { %1817 = vmatpush3.bf16.msra.mxu0 %v2085_v6  ;;  %v494_v5 = vsel %vm490_vm1, %v485_v59, %v486_v63  ;;  %v495_v6 = vsel %vm490_vm1, %v484_v41, %v485_v59  ;;  %v492_v7 = vsel %vm490_vm1, %v487_v2, %v488_v62  ;;  %v493_v3 = vsel %vm490_vm1, %v486_v63, %v487_v2 }
  0xca   :  { %1818 = vmatprep.subr.bf16.mxu0 %v2086_v13  ;;  %v500_v8 = vpack.c.bf16 %v494_v5, %v495_v6  ;;  %v501_v9 = vpack.c.bf16 %v492_v7, %v493_v3  ;;  %v491_v1 = vsel %vm490_vm1, %v488_v62, %v489_v0  ;;  %v498_v10 = vsel %vm490_vm1, %v489_v0, %v482_v43 }
  0xcb   :  { %v502_v12 = vpack.c.bf16 %v498_v10, %v491_v1 }
  0xcc   :  { %1811 = vmatmul.mubr.bf16.gmra.mrb[4].mxu0 %v238_v11  ;;  %v2124_v11 = vld [vmem:[#allocation4 + $0x1c0] sm:$0xff]  }
  0xcd   :  { %1819 = vmatpush3.bf16.msra.mxu0 %v2086_v13  ;;  %1830 = vmatprep.mubr.bf16.mxu0 %v215_v19  ;;  %v2105_v13 = vld [vmem:[#allocation4 + $0x128] sm:$0xff]   ;;  %v2128_v19 = vld [vmem:[#allocation4 + $0x1d8] sm:$0xff]  }
  0xce   :  { %1820 = vmatprep.subr.bf16.mxu0 %v2087_v17  ;;  %1872 = vmatprep.subr.bf16.mxu1 %v2105_v13 }
  0xcf   :  { %1873 = vmatpush3.bf16.msra.mxu1 %v2105_v13 }
  0xd0   :  { %1874 = vmatprep.subr.bf16.mxu1 %v2106_v14 }
  0xd1   :  { %1821 = vmatpush3.bf16.msra.mxu0 %v2087_v17  ;;  %v2126_v17 = vld [vmem:[#allocation4 + $0x1d0] sm:$0xff]  }
  0xd2   :  { %1822 = vmatprep.subr.bf16.mxu0 %v2088_v21 }
  0xd3   :  { %1875 = vmatpush3.bf16.msra.mxu1 %v2106_v14 }
  0xd4   :  { %1876 = vmatprep.subr.bf16.mxu1 %v2107_v15 }
  0xd5   :  { %1823 = vmatpush3.bf16.msra.mxu0 %v2088_v21  ;;  %v2130_v21 = vld [vmem:[#allocation4 + $0x1e0] sm:$0xff]  }
  0xd6   :  { %1824 = vmatprep.subr.bf16.mxu0 %v2089_v22 }
  0xd7   :  { %1877 = vmatpush3.bf16.msra.mxu1 %v2107_v15 }
  0xd8   :  { %1886 = vmatprep.subr.bf16.mxu1 %v2425_v4 }
  0xd9   :  { %1825 = vmatpush3.bf16.msra.mxu0 %v2089_v22  ;;  %v643_v22 = vsub.s32 2, %v2314_v18 }
  0xda   :  { %1826 = vmatprep.subr.bf16.mxu0 %v2090_v23 }
  0xdd   :  { %1827 = vmatpush3.bf16.msra.mxu0 %v2090_v23  ;;  %v644_v23 = vrot.slane %v2317_v20, %v643_v22 }
  0xde   :  { %1828 = vmatprep.subr.bf16.mxu0 %v2091_v25 }
  0xe1   :  { %1829 = vmatpush3.bf16.msra.mxu0 %v2091_v25 }
  0xe2   :  { %1838 = vmatprep.subr.bf16.mxu0 %v2092_v28 }
  0xe4   :  { %1831 = vmatmul.mubr.bf16.vlgmr.msra.gmra.mrb[0].mxu0 %v216_v36 }
  0xe5   :  { %1834 = vmatprep.mubr.bf16.mxu0 %v217_v39  ;;  %1839 = vmatpush3.bf16.msra.mxu0 %v2092_v28 }
  0xe6   :  { %1840 = vmatprep.subr.bf16.mxu0 %v2093_v38 }
  0xe9   :  { %1841 = vmatpush3.bf16.msra.mxu0 %v2093_v38 }
  0xea   :  { %1842 = vmatprep.subr.bf16.mxu0 %v2094_v45 }
  0xec   :  { %1835 = vmatmul.mubr.bf16.gmra.mrb[4].mxu0 %v218_v51 }
  0xed   :  { %1843 = vmatpush3.bf16.msra.mxu0 %v2094_v45  ;;  %1854 = vmatprep.mubr.bf16.mxu0 %v499_v54 }
  0xee   :  { %1844 = vmatprep.subr.bf16.mxu0 %v2095_v53 }
  0xf1   :  { %1845 = vmatpush3.bf16.msra.mxu0 %v2095_v53 }
  0xf2   :  { %1846 = vmatprep.subr.bf16.mxu0 %v2096_v55 }
  0xf5   :  { %1847 = vmatpush3.bf16.msra.mxu0 %v2096_v55 }
  0xf6   :  { %1848 = vmatprep.subr.bf16.mxu0 %v2097_v56 }
  0xf9   :  { %1849 = vmatpush3.bf16.msra.mxu0 %v2097_v56 }
  0xfa   :  { %1850 = vmatprep.subr.bf16.mxu0 %v2098_v57 }
  0xfd   :  { %1851 = vmatpush3.bf16.msra.mxu0 %v2098_v57 }
  0xfe   :  { %1852 = vmatprep.subr.bf16.mxu0 %v2099_v58 }
 0x101   :  { %1853 = vmatpush3.bf16.msra.mxu0 %v2099_v58 }
 0x102   :  { %1934 = vmatprep.subr.bf16.mxu0 %v2124_v11 }
 0x104   :  { %1855 = vmatmul.mubr.bf16.vlgmr.msra.gmra.mrb[0].mxu0 %v500_v8  ;;  %v2109_v8 = vld [vmem:[#allocation4 + $0xc8] sm:$0xff]  }
 0x105   :  { %1858 = vmatprep.mubr.bf16.mxu0 %v501_v9  ;;  %1935 = vmatpush3.bf16.msra.mxu0 %v2124_v11 }
 0x106   :  { %1936 = vmatprep.subr.bf16.mxu0 %v2125_v16 }
 0x109   :  { %1937 = vmatpush3.bf16.msra.mxu0 %v2125_v16 }
 0x10a   :  { %1938 = vmatprep.subr.bf16.mxu0 %v2126_v17 }
 0x10c   :  { %1859 = vmatmul.mubr.bf16.gmra.mrb[4].mxu0 %v502_v12 }
 0x10d   :  { %1939 = vmatpush3.bf16.msra.mxu0 %v2126_v17 }
 0x10e   :  { %1940 = vmatprep.subr.bf16.mxu0 %v2128_v19 }
 0x111   :  { %1941 = vmatpush3.bf16.msra.mxu0 %v2128_v19  ;;  %v2110_v19 = vld [vmem:[#allocation4 + $0xd0] sm:$0xff]  }
 0x112   :  { %1942 = vmatprep.subr.bf16.mxu0 %v2130_v21 }
 0x115   :  { %1943 = vmatpush3.bf16.msra.mxu0 %v2130_v21 }
 0x1d7   :  { %v1856_v25 = vpop.f32.mrb[0].mxu0 }
 0x1d8   :  { %v647_v26 = vadd.f32 %v1856_v25, %v644_v23  ;;  %v602_v27 = vpop.f32.mrb[1].mxu0 }
 0x1d9   :  { %v645_v28 = vadd.f32 %v644_v23, %v602_v27  ;;  %v1857_v31 = vpop.f32.mrb[2].mxu0 }
 0x1da   :  { %v655_v32 = vmax.f32 %v647_v26, 0.0  ;;  %v648_v33 = vadd.f32 %v1857_v31, %v644_v23  ;;  %v605_v34 = vpop.f32.mrb[3].mxu0 }
 0x1db   :  { %v653_v35 = vmax.f32 %v645_v28, 0.0  ;;  %v646_v36 = vadd.f32 %v644_v23, %v605_v34 }
 0x1dc   :  { %v663_v37 = vmul.f32 %v2346_v61, %v655_v32  ;;  %v656_v38 = vmax.f32 %v648_v33, 0.0 }
 0x1dd   :  { %v2432_v39 = vmul.f32 %v2335_v50, %v653_v35  ;;  %v654_v40 = vmax.f32 %v646_v36, 0.0 }
 0x1de   :  { %v671_v41 = vrot.slane %v663_v37, 7  ;;  %v664_v43 = vmul.f32 %v2344_v60, %v656_v38  ;;  %v955_v44 = vrot.slane %v663_v37, 1 }
 0x1df   :  { %v669_v45 = vrot.slane %v2432_v39, 7  ;;  %v953_v46 = vrot.slane %v2432_v39, 1  ;;  %v662_v47 = vmul.f32 %v2333_v49, %v654_v40  ;;  %v1860_v48 = vpop.f32.mrb[4].mxu0 }
 0x1e0   :  { %v672_v51 = vrot.slane %v664_v43, 7  ;;  %v956_v52 = vrot.slane %v664_v43, 1  ;;  %v651_v53 = vadd.f32 %v1860_v48, %v644_v23  ;;  %v618_v54 = vpop.f32.mrb[5].mxu0  ;;  %v707_v55 = vpack.c.bf16 %v664_v43, %v663_v37  ;;  %v2111_v37 = vld [vmem:[#allocation4 + $0xd8] sm:$0xff]  }
 0x1e1   :  { %v670_v56 = vrot.slane %v662_v47, 7  ;;  %v954_v57 = vrot.slane %v662_v47, 1  ;;  %v649_v58 = vadd.f32 %v644_v23, %v618_v54  ;;  %v1861_v59 = vpop.f32.mrb[6].mxu0  ;;  %v706_v62 = vpack.c.bf16 %v662_v47, %v2432_v39  ;;  %v2117_v39 = vld [vmem:[#allocation4 + $0x148] sm:$0xff]  }
 0x1e2   :  { %v2441_v63 = vsel %vm206_vm0, %v671_v41, %v672_v51  ;;  %v2445_v2 = vsel %vm490_vm1, %v955_v44, %v956_v52  ;;  %v659_v5 = vmax.f32 %v651_v53, 0.0  ;;  %v652_v6 = vadd.f32 %v1861_v59, %v644_v23  ;;  %v621_v7 = vpop.f32.mrb[7].mxu0  ;;  %v2114_v59 = vld [vmem:[#allocation4 + $0xf0] sm:$0xff]  }
 0x1e3   :  { %v2449_v3 = vsel %vm206_vm0, %v670_v56, %v671_v41  ;;  %v657_v9 = vmax.f32 %v649_v58, 0.0  ;;  %v650_v0 = vadd.f32 %v644_v23, %v621_v7  ;;  %1878 = vmatprep.mubr.bf16.mxu1 %v706_v62  ;;  %v683_v1 = vsel %vm206_vm0, %v669_v45, %v670_v56  ;;  %v2112_v56 = vld [vmem:[#allocation4 + $0xe0] sm:$0xff]   ;;  %v2113_v58 = vld [vmem:[#allocation4 + $0xe8] sm:$0xff]   ;;  %v2115_v62 = vld [vmem:[#allocation4 + $0xf8] sm:$0xff]  }
 0x1e4   :  { %v667_v10 = vmul.f32 %v2346_v61, %v659_v5  ;;  %v660_v12 = vmax.f32 %v652_v6, 0.0  ;;  %1879 = vmatmul.mubr.bf16.vlgmr.msra.gmra.mrb[0].mxu1 %v707_v55  ;;  %v686_v13 = vpack.c.bf16 %v2441_v63, %v2449_v3  ;;  %v2458_v14 = vsel %vm490_vm1, %v954_v57, %v955_v44  ;;  %v2116_v63 = vld [vmem:[#allocation4 + $0x140] sm:$0xff]   ;;  %v2121_v6 = vld [vmem:[#allocation4 + $0x168] sm:$0xff]   ;;  %v2122_v7 = vld [vmem:[#allocation4 + $0x170] sm:$0xff]  }
 0x1e5   :  { %v665_v15 = vmul.f32 %v2335_v50, %v657_v9  ;;  %v658_v11 = vmax.f32 %v650_v0, 0.0  ;;  %1887 = vmatpush3.bf16.msra.mxu1 %v2425_v4  ;;  %v2466_v16 = vsel %vm490_vm1, %v953_v46, %v954_v57  ;;  %v2120_v5 = vld [vmem:[#allocation4 + $0x160] sm:$0xff]   ;;  %v2129_v9 = vld [vmem:[#allocation4 + $0x188] sm:$0xff]   ;;  %v2131_v0 = vld [vmem:[#allocation4 + $0x190] sm:$0xff]  }
 0x1e6   :  { %v668_v17 = vmul.f32 %v2344_v60, %v660_v12  ;;  %1888 = vmatprep.subr.bf16.mxu1 %v2109_v8  ;;  %v969_v21 = vpack.c.bf16 %v2458_v14, %v2466_v16  ;;  %v675_v22 = vrot.slane %v667_v10, 7  ;;  %v959_v27 = vrot.slane %v667_v10, 1  ;;  %v2127_v3 = vld [vmem:[#allocation4 + $0x180] sm:$0xff]   ;;  %v2134_v12 = vld [vmem:[#allocation4 + $0x1f0] sm:$0xff]   ;;  %v2136_v14 = vld [vmem:[#allocation4 + $0x1f8] sm:$0xff]  }
 0x1e7   :  { %v673_v23 = vrot.slane %v665_v15, 7  ;;  %v957_v25 = vrot.slane %v665_v15, 1  ;;  %v666_v26 = vmul.f32 %v2333_v49, %v658_v11  ;;  %v2498_v11 = vld [vmem:[#allocation4 + $0x200] sm:$0xff]   ;;  %v2139_v16 = vld [vmem:[#allocation4 + $0x1b0] sm:$0xff]  }
 0x1e8   :  { %v676_v4 = vrot.slane %v668_v17, 7  ;;  %v960_v28 = vrot.slane %v668_v17, 1  ;;  %v709_v31 = vpack.c.bf16 %v668_v17, %v667_v10  ;;  %v2133_v10 = vld [vmem:[#allocation4 + $0x198] sm:$0xff]  }
 0x1e9   :  { %v2474_v32 = vsel %vm490_vm1, %v956_v52, %v957_v25  ;;  %v674_v33 = vrot.slane %v666_v26, 7  ;;  %v958_v34 = vrot.slane %v666_v26, 1  ;;  %1889 = vmatpush3.bf16.msra.mxu1 %v2109_v8  ;;  %v708_v35 = vpack.c.bf16 %v666_v26, %v665_v15  ;;  %v2123_v8 = vld [vmem:[#allocation4 + $0x178] sm:$0xff]   ;;  %v2137_v15 = vld [vmem:[#allocation4 + $0x1a8] sm:$0xff]  }
 0x1ea   :  { %1890 = vmatprep.subr.bf16.mxu1 %v2110_v19  ;;  %v684_v36 = vsel %vm206_vm0, %v676_v4, %v669_v45  ;;  %v680_v38 = vsel %vm206_vm0, %v672_v51, %v673_v23  ;;  %v677_v40 = vsel %vm206_vm0, %v675_v22, %v676_v4  ;;  %v970_v41 = vpack.c.bf16 %v2474_v32, %v2445_v2  ;;  %v2119_v2 = vld [vmem:[#allocation4 + $0x158] sm:$0xff]  }
 0x1eb   :  { %1882 = vmatprep.mubr.bf16.mxu1 %v708_v35  ;;  %v685_v43 = vpack.c.bf16 %v683_v1, %v684_v36  ;;  %v679_v44 = vsel %vm206_vm0, %v673_v23, %v674_v33  ;;  %v678_v47 = vsel %vm206_vm0, %v674_v33, %v675_v22  ;;  %v962_v45 = vsel %vm490_vm1, %v958_v34, %v959_v27  ;;  %v2132_v1 = vld [vmem:[#allocation4 + $0x1e8] sm:$0xff]   ;;  %v2141_v17 = vld [vmem:[#allocation4 + $0x1b8] sm:$0xff]  }
 0x1ec   :  { %1883 = vmatmul.mubr.bf16.gmra.mrb[4].mxu1 %v709_v31  ;;  %v687_v48 = vpack.c.bf16 %v679_v44, %v680_v38  ;;  %v688_v51 = vpack.c.bf16 %v677_v40, %v678_v47  ;;  %v963_v52 = vsel %vm490_vm1, %v957_v25, %v958_v34  ;;  %v961_v53 = vsel %vm490_vm1, %v959_v27, %v960_v28 }
 0x1ed   :  { %1891 = vmatpush3.bf16.msra.mxu1 %v2110_v19  ;;  %1902 = vmatprep.mubr.bf16.mxu1 %v685_v43  ;;  %v971_v54 = vpack.c.bf16 %v962_v45, %v963_v52  ;;  %v968_v55 = vsel %vm490_vm1, %v960_v28, %v953_v46  ;;  %v2118_v46 = vld [vmem:[#allocation4 + $0x150] sm:$0xff]   ;;  %v1113_v19 = vsub.s32 3, %v2314_v18 }
 0x1ee   :  { %1892 = vmatprep.subr.bf16.mxu1 %v2111_v37  ;;  %v972_v57 = vpack.c.bf16 %v968_v55, %v961_v53  ;;  %1944 = vmatprep.subr.bf16.mxu0 %v2132_v1  ;;  %v2146_v18 = vld [vmem:[#allocation4 + $0x230] sm:$0xff]  }
 0x1ef   :  { %1945 = vmatpush3.bf16.msra.mxu0 %v2132_v1 }
 0x1f0   :  { %1946 = vmatprep.subr.bf16.mxu0 %v2134_v12 }
 0x1f1   :  { %1893 = vmatpush3.bf16.msra.mxu1 %v2111_v37 }
 0x1f2   :  { %1894 = vmatprep.subr.bf16.mxu1 %v2112_v56 }
 0x1f3   :  { %1947 = vmatpush3.bf16.msra.mxu0 %v2134_v12 }
 0x1f4   :  { %1948 = vmatprep.subr.bf16.mxu0 %v2136_v14 }
 0x1f5   :  { %1895 = vmatpush3.bf16.msra.mxu1 %v2112_v56 }
 0x1f6   :  { %1896 = vmatprep.subr.bf16.mxu1 %v2113_v58 }
 0x1f7   :  { %1949 = vmatpush3.bf16.msra.mxu0 %v2136_v14 }
 0x1f8   :  { %1982 = vmatprep.subr.bf16.mxu0 %v2498_v11 }
 0x1f9   :  { %1897 = vmatpush3.bf16.msra.mxu1 %v2113_v58 }
 0x1fa   :  { %1898 = vmatprep.subr.bf16.mxu1 %v2114_v59 }
 0x1fd   :  { %1899 = vmatpush3.bf16.msra.mxu1 %v2114_v59 }
 0x1fe   :  { %1900 = vmatprep.subr.bf16.mxu1 %v2115_v62 }
 0x201   :  { %1901 = vmatpush3.bf16.msra.mxu1 %v2115_v62 }
 0x202   :  { %1910 = vmatprep.subr.bf16.mxu1 %v2116_v63 }
 0x204   :  { %1903 = vmatmul.mubr.bf16.vlgmr.msra.gmra.mrb[0].mxu1 %v686_v13  ;;  %v2135_v13 = vld [vmem:[#allocation4 + $0x1a0] sm:$0xff]  }
 0x205   :  { %1906 = vmatprep.mubr.bf16.mxu1 %v687_v48  ;;  %1911 = vmatpush3.bf16.msra.mxu1 %v2116_v63 }
 0x206   :  { %1912 = vmatprep.subr.bf16.mxu1 %v2117_v39 }
 0x209   :  { %1913 = vmatpush3.bf16.msra.mxu1 %v2117_v39 }
 0x20a   :  { %1914 = vmatprep.subr.bf16.mxu1 %v2118_v46 }
 0x20c   :  { %1907 = vmatmul.mubr.bf16.gmra.mrb[4].mxu1 %v688_v51 }
 0x20d   :  { %1915 = vmatpush3.bf16.msra.mxu1 %v2118_v46  ;;  %1926 = vmatprep.mubr.bf16.mxu1 %v969_v21  ;;  %v1114_v21 = vrot.slane %v2317_v20, %v1113_v19 }
 0x20e   :  { %1916 = vmatprep.subr.bf16.mxu1 %v2119_v2 }
 0x211   :  { %1917 = vmatpush3.bf16.msra.mxu1 %v2119_v2  ;;  %v2140_v2 = vld [vmem:[#allocation4 + $0x208] sm:$0xff]  }
 0x212   :  { %1918 = vmatprep.subr.bf16.mxu1 %v2120_v5 }
 0x215   :  { %1919 = vmatpush3.bf16.msra.mxu1 %v2120_v5 }
 0x216   :  { %1920 = vmatprep.subr.bf16.mxu1 %v2121_v6 }
 0x219   :  { %1921 = vmatpush3.bf16.msra.mxu1 %v2121_v6 }
 0x21a   :  { %1922 = vmatprep.subr.bf16.mxu1 %v2122_v7 }
 0x21d   :  { %1923 = vmatpush3.bf16.msra.mxu1 %v2122_v7 }
 0x21e   :  { %1924 = vmatprep.subr.bf16.mxu1 %v2123_v8 }
 0x221   :  { %1925 = vmatpush3.bf16.msra.mxu1 %v2123_v8 }
 0x222   :  { %1958 = vmatprep.subr.bf16.mxu1 %v2127_v3 }
 0x224   :  { %1927 = vmatmul.mubr.bf16.vlgmr.msra.gmra.mrb[0].mxu1 %v970_v41 }
 0x225   :  { %1930 = vmatprep.mubr.bf16.mxu1 %v971_v54  ;;  %1959 = vmatpush3.bf16.msra.mxu1 %v2127_v3 }
 0x226   :  { %1960 = vmatprep.subr.bf16.mxu1 %v2129_v9 }
 0x229   :  { %1961 = vmatpush3.bf16.msra.mxu1 %v2129_v9 }
 0x22a   :  { %1962 = vmatprep.subr.bf16.mxu1 %v2131_v0 }
 0x22c   :  { %1931 = vmatmul.mubr.bf16.gmra.mrb[4].mxu1 %v972_v57 }
 0x22d   :  { %1963 = vmatpush3.bf16.msra.mxu1 %v2131_v0 }
 0x22e   :  { %1964 = vmatprep.subr.bf16.mxu1 %v2133_v10 }
 0x231   :  { %1965 = vmatpush3.bf16.msra.mxu1 %v2133_v10 }
 0x232   :  { %1966 = vmatprep.subr.bf16.mxu1 %v2135_v13 }
 0x235   :  { %1967 = vmatpush3.bf16.msra.mxu1 %v2135_v13 }
 0x236   :  { %1968 = vmatprep.subr.bf16.mxu1 %v2137_v15 }
 0x239   :  { %1969 = vmatpush3.bf16.msra.mxu1 %v2137_v15 }
 0x23a   :  { %1970 = vmatprep.subr.bf16.mxu1 %v2139_v16 }
 0x23d   :  { %1971 = vmatpush3.bf16.msra.mxu1 %v2139_v16  ;;  %v2142_v16 = vld [vmem:[#allocation4 + $0x210] sm:$0xff]  }
 0x23e   :  { %1972 = vmatprep.subr.bf16.mxu1 %v2141_v17 }
 0x241   :  { %1973 = vmatpush3.bf16.msra.mxu1 %v2141_v17 }
 0x242   :  { %2006 = vmatprep.subr.bf16.mxu1 %v2498_v11 }
 0x2f7   :  { %v1928_v22 = vpop.f32.mrb[0].mxu1 }
 0x2f8   :  { %v1117_v23 = vadd.f32 %v1928_v22, %v1114_v21  ;;  %v1072_v25 = vpop.f32.mrb[1].mxu1 }
 0x2f9   :  { %v1115_v26 = vadd.f32 %v1114_v21, %v1072_v25  ;;  %v1929_v27 = vpop.f32.mrb[2].mxu1 }
 0x2fa   :  { %v1125_v4 = vmax.f32 %v1117_v23, 0.0  ;;  %v1118_v28 = vadd.f32 %v1929_v27, %v1114_v21  ;;  %v1075_v31 = vpop.f32.mrb[3].mxu1 }
 0x2fb   :  { %v1123_v32 = vmax.f32 %v1115_v26, 0.0  ;;  %v1116_v33 = vadd.f32 %v1114_v21, %v1075_v31 }
 0x2fc   :  { %v1133_v34 = vmul.f32 %v2346_v61, %v1125_v4  ;;  %v1126_v35 = vmax.f32 %v1118_v28, 0.0 }
 0x2fd   :  { %v1131_v36 = vmul.f32 %v2335_v50, %v1123_v32  ;;  %v1124_v37 = vmax.f32 %v1116_v33, 0.0 }
 0x2fe   :  { %v1141_v38 = vrot.slane %v1133_v34, 7  ;;  %v1134_v40 = vmul.f32 %v2344_v60, %v1126_v35  ;;  %v1417_v20 = vrot.slane %v1133_v34, 1 }
 0x2ff   :  { %v1139_v41 = vrot.slane %v1131_v36, 7  ;;  %v1415_v43 = vrot.slane %v1131_v36, 1  ;;  %v1132_v44 = vmul.f32 %v2333_v49, %v1124_v37  ;;  %v1932_v47 = vpop.f32.mrb[4].mxu1 }
 0x300   :  { %v1142_v45 = vrot.slane %v1134_v40, 7  ;;  %v1177_v48 = vpack.c.bf16 %v1134_v40, %v1133_v34  ;;  %v1418_v51 = vrot.slane %v1134_v40, 1  ;;  %v1121_v52 = vadd.f32 %v1932_v47, %v1114_v21  ;;  %v1088_v53 = vpop.f32.mrb[5].mxu1 }
 0x301   :  { %v1140_v54 = vrot.slane %v1132_v44, 7  ;;  %v1416_v55 = vrot.slane %v1132_v44, 1  ;;  %v1119_v56 = vadd.f32 %v1114_v21, %v1088_v53  ;;  %v1933_v57 = vpop.f32.mrb[6].mxu1  ;;  %v1176_v58 = vpack.c.bf16 %v1132_v44, %v1131_v36 }
 0x302   :  { %v1151_v59 = vsel %vm206_vm0, %v1141_v38, %v1142_v45  ;;  %v2512_v62 = vsel %vm490_vm1, %v1417_v20, %v1418_v51  ;;  %v1129_v63 = vmax.f32 %v1121_v52, 0.0  ;;  %v1122_v39 = vadd.f32 %v1933_v57, %v1114_v21  ;;  %v1091_v46 = vpop.f32.mrb[7].mxu1 }
 0x303   :  { %v1152_v5 = vsel %vm206_vm0, %v1140_v54, %v1141_v38  ;;  %v1127_v6 = vmax.f32 %v1119_v56, 0.0  ;;  %v1120_v7 = vadd.f32 %v1114_v21, %v1091_v46  ;;  %1950 = vmatprep.mubr.bf16.mxu0 %v1176_v58  ;;  %v1153_v8 = vsel %vm206_vm0, %v1139_v41, %v1140_v54  ;;  %v2143_v38 = vld [vmem:[#allocation4 + $0x218] sm:$0xff]  }
 0x304   :  { %v1137_v3 = vmul.f32 %v2346_v61, %v1129_v63  ;;  %v1130_v9 = vmax.f32 %v1122_v39, 0.0  ;;  %1951 = vmatmul.mubr.bf16.vlgmr.msra.gmra.mrb[8].mxu0 %v1177_v48  ;;  %v1428_v0 = vsel %vm490_vm1, %v1416_v55, %v1417_v20  ;;  %v1429_v1 = vsel %vm490_vm1, %v1415_v43, %v1416_v55  ;;  %v2145_v48 = vld [vmem:[#allocation4 + $0x228] sm:$0xff]  }
 0x305   :  { %v1135_v10 = vmul.f32 %v2335_v50, %v1127_v6  ;;  %v1128_v12 = vmax.f32 %v1120_v7, 0.0  ;;  %1983 = vmatpush3.bf16.msra.mxu0 %v2498_v11  ;;  %v1431_v13 = vpack.c.bf16 %v1428_v0, %v1429_v1  ;;  %v1156_v14 = vpack.c.bf16 %v1151_v59, %v1152_v5 }
 0x306   :  { %v1138_v15 = vmul.f32 %v2344_v60, %v1130_v9  ;;  %1984 = vmatprep.subr.bf16.mxu0 %v2140_v2  ;;  %v1145_v61 = vrot.slane %v1137_v3, 7  ;;  %v1421_v22 = vrot.slane %v1137_v3, 1 }
 0x307   :  { %v1143_v17 = vrot.slane %v1135_v10, 7  ;;  %v1419_v19 = vrot.slane %v1135_v10, 1  ;;  %v1136_v21 = vmul.f32 %v2333_v49, %v1128_v12 }
 0x308   :  { %v1146_v23 = vrot.slane %v1138_v15, 7  ;;  %v1422_v25 = vrot.slane %v1138_v15, 1  ;;  %v1179_v26 = vpack.c.bf16 %v1138_v15, %v1137_v3 }
 0x309   :  { %v1426_v50 = vsel %vm490_vm1, %v1418_v51, %v1419_v19  ;;  %v1144_v27 = vrot.slane %v1136_v21, 7  ;;  %v1420_v4 = vrot.slane %v1136_v21, 1  ;;  %1985 = vmatpush3.bf16.msra.mxu0 %v2140_v2  ;;  %v1178_v28 = vpack.c.bf16 %v1136_v21, %v1135_v10  ;;  %v2147_v51 = vld [vmem:[#allocation4 + $0x238] sm:$0xff]  }
 0x30a   :  { %v1423_v60 = vsel %vm490_vm1, %v1421_v22, %v1422_v25  ;;  %v1430_v31 = vsel %vm490_vm1, %v1422_v25, %v1415_v43  ;;  %1986 = vmatprep.subr.bf16.mxu0 %v2142_v16  ;;  %v1154_v49 = vsel %vm206_vm0, %v1146_v23, %v1139_v41  ;;  %v1150_v32 = vsel %vm206_vm0, %v1142_v45, %v1143_v17  ;;  %v2144_v45 = vld [vmem:[#allocation4 + $0x220] sm:$0xff]  }
 0x30b   :  { %1954 = vmatprep.mubr.bf16.mxu0 %v1178_v28  ;;  %v1155_v33 = vpack.c.bf16 %v1153_v8, %v1154_v49  ;;  %v1149_v34 = vsel %vm206_vm0, %v1143_v17, %v1144_v27  ;;  %v1147_v35 = vsel %vm206_vm0, %v1145_v61, %v1146_v23  ;;  %v1148_v36 = vsel %vm206_vm0, %v1144_v27, %v1145_v61 }
 0x30c   :  { %1955 = vmatmul.mubr.bf16.gmra.mrb[12].mxu0 %v1179_v26  ;;  %v1157_v37 = vpack.c.bf16 %v1149_v34, %v1150_v32  ;;  %v1158_v40 = vpack.c.bf16 %v1147_v35, %v1148_v36  ;;  %v1424_v20 = vsel %vm490_vm1, %v1420_v4, %v1421_v22  ;;  %v1425_v41 = vsel %vm490_vm1, %v1419_v19, %v1420_v4 }
 0x30d   :  { %1987 = vmatpush3.bf16.msra.mxu0 %v2142_v16  ;;  %1974 = vmatprep.mubr.bf16.mxu1 %v1155_v33  ;;  %v1433_v43 = vpack.c.bf16 %v1424_v20, %v1425_v41  ;;  %v1432_v44 = vpack.c.bf16 %v1426_v50, %v2512_v62  ;;  %v1434_v47 = vpack.c.bf16 %v1430_v31, %v1423_v60 }
 0x30e   :  { %1998 = vmatprep.mubr.bf16.mxu0 %v1431_v13  ;;  %1975 = vmatmul.mubr.bf16.vlgmr.msra.gmra.mrb[8].mxu1 %v1156_v14 }
 0x30f   :  { %2014 = vmatpush3.bf16.msra.mxu1 %v2498_v11  ;;  %1978 = vmatprep.mubr.bf16.mxu1 %v1157_v37 }
 0x310   :  { %1988 = vmatprep.subr.bf16.mxu0 %v2143_v38  ;;  %2007 = vmatprep.subr.bf16.mxu1 %v2140_v2 }
 0x311   :  { %1989 = vmatpush3.bf16.msra.mxu0 %v2143_v38 }
 0x312   :  { %1990 = vmatprep.subr.bf16.mxu0 %v2144_v45 }
 0x313   :  { %2015 = vmatpush3.bf16.msra.mxu1 %v2140_v2 }
 0x314   :  { %2008 = vmatprep.subr.bf16.mxu1 %v2142_v16 }
 0x315   :  { %1991 = vmatpush3.bf16.msra.mxu0 %v2144_v45 }
 0x316   :  { %1979 = vmatmul.mubr.bf16.gmra.mrb[12].mxu1 %v1158_v40  ;;  %1992 = vmatprep.subr.bf16.mxu0 %v2145_v48 }
 0x317   :  { %2016 = vmatpush3.bf16.msra.mxu1 %v2142_v16  ;;  %2002 = vmatprep.mubr.bf16.mxu1 %v1433_v43 }
 0x318   :  { %2009 = vmatprep.subr.bf16.mxu1 %v2143_v38 }
 0x319   :  { %1993 = vmatpush3.bf16.msra.mxu0 %v2145_v48 }
 0x31a   :  { %1994 = vmatprep.subr.bf16.mxu0 %v2146_v18 }
 0x31b   :  { %2017 = vmatpush3.bf16.msra.mxu1 %v2143_v38 }
 0x31c   :  { %2010 = vmatprep.subr.bf16.mxu1 %v2144_v45 }
 0x31d   :  { %1995 = vmatpush3.bf16.msra.mxu0 %v2146_v18 }
 0x31e   :  { %1996 = vmatprep.subr.bf16.mxu0 %v2147_v51 }
 0x31f   :  { %2018 = vmatpush3.bf16.msra.mxu1 %v2144_v45 }
 0x320   :  { %2011 = vmatprep.subr.bf16.mxu1 %v2145_v48 }
 0x321   :  { %1997 = vmatpush3.bf16.msra.mxu0 %v2147_v51 }
 0x323   :  { %2019 = vmatpush3.bf16.msra.mxu1 %v2145_v48 }
 0x324   :  { %1999 = vmatmul.mubr.bf16.vlgmr.msra.gmra.mrb[16].mxu0 %v1432_v44  ;;  %2012 = vmatprep.subr.bf16.mxu1 %v2146_v18 }
 0x327   :  { %2020 = vmatpush3.bf16.msra.mxu1 %v2146_v18 }
 0x328   :  { %2013 = vmatprep.subr.bf16.mxu1 %v2147_v51 }
 0x32b   :  { %2021 = vmatpush3.bf16.msra.mxu1 %v2147_v51 }
 0x32e   :  { %2003 = vmatmul.mubr.bf16.vlgmr.msra.gmra.mrb[16].mxu1 %v1434_v47 }
 0x3d7   :  { %v1952_v11 = vpop.f32.mrb[8].mxu0 }
 0x3d8   :  { %v1279_v52 = vpop.f32.mrb[9].mxu0 }
 0x3d9   :  { %v1953_v53 = vpop.f32.mrb[10].mxu0 }
 0x3da   :  { %v1281_v54 = vpop.f32.mrb[11].mxu0 }
 0x3df   :  { %v1956_v55 = vpop.f32.mrb[12].mxu0 }
 0x3e0   :  { %v1293_v56 = vpop.f32.mrb[13].mxu0 }
 0x3e1   :  { %v1957_v57 = vpop.f32.mrb[14].mxu0  ;;  %v1976_v58 = vpop.f32.mrb[8].mxu1 }
 0x3e2   :  { %v1396_v59 = vadd.f32 %v1976_v58, %v1952_v11  ;;  %v1295_v62 = vpop.f32.mrb[15].mxu0  ;;  %v1388_v63 = vpop.f32.mrb[9].mxu1 }
 0x3e3   :  { %v1977_v39 = vpop.f32.mrb[10].mxu1 }
 0x3e4   :  { %v1390_v46 = vpop.f32.mrb[11].mxu1 }
 0x3e5   :  { %v1391_v2 = vadd.f32 %v1390_v46, %v1281_v54 }
 0x3e9   :  { %v1980_v5 = vpop.f32.mrb[12].mxu1 }
 0x3ea   :  { %v1410_v6 = vadd.f32 %v1980_v5, %v1956_v55  ;;  %v1402_v7 = vpop.f32.mrb[13].mxu1 }
 0x3eb   :  { %v1981_v8 = vpop.f32.mrb[14].mxu1 }
 0x3ec   :  { %v1404_v3 = vpop.f32.mrb[15].mxu1 }
 0x3ed   :  { %v1405_v9 = vadd.f32 %v1404_v3, %v1295_v62 }
 0x3f7   :  { %v2000_v0 = vpop.f32.mrb[16].mxu0 }
 0x3f8   :  { %v1562_v1 = vadd.f32 %v2000_v0, %v1396_v59  ;;  %v1534_v10 = vpop.f32.mrb[17].mxu0 }
 0x3f9   :  { %v2001_v12 = vpop.f32.mrb[18].mxu0 }
 0x3fa   :  { %v1566_v13 = vadd.f32 %v1562_v1, %v2327_v30  ;;  %v1536_v14 = vpop.f32.mrb[19].mxu0 }
 0x3fb   :  { %v1561_v15 = vadd.f32 %v1536_v14, %v1391_v2 }
 0x3fc   :  { %1570 = vst [vmem:[#allocation9 + $0x8] sm:$0xff] %v1566_v13 }
 0x3fd   :  { %v1565_v16 = vadd.f32 %v1561_v15, %v2321_v24 }
 0x3ff   :  { %1569 = vst [vmem:[#allocation9] sm:$0xff] %v1565_v16 }
 0x401   :  { %v2004_v61 = vpop.f32.mrb[16].mxu1 }
 0x402   :  { %v1564_v17 = vadd.f32 %v2004_v61, %v1410_v6  ;;  %v1548_v19 = vpop.f32.mrb[17].mxu1 }
 0x403   :  { %v2005_v21 = vpop.f32.mrb[18].mxu1 }
 0x404   :  { %v1568_v22 = vadd.f32 %v1564_v17, %v2331_v42  ;;  %v1550_v23 = vpop.f32.mrb[19].mxu1 }
 0x405   :  { %v1563_v25 = vadd.f32 %v1550_v23, %v1405_v9 }
 0x406   :  { %1572 = vst [vmem:[#allocation9 + $0x18] sm:$0xff] %v1568_v22 }
 0x407   :  { %v1567_v26 = vadd.f32 %v1563_v25, %v2325_v29 }
 0x409   :  { %1571 = vst [vmem:[#allocation9 + $0x10] sm:$0xff] %v1567_v26 }
 0x40a   :  { %2225 = shalt.err (!%p2222_p0)
}
 0x40b   :  { %s2226_s26 = scalar_lea.hbm %s2568_s3, 512 }
 0x40c   :  { %p2227_p1 = scmp.ne.s32.totalorder %s2568_s3, %s2226_s26  ;;  %p2230_p2 = scmp.lt.u32.totalorder %s2226_s26, %s2568_s3 }
 0x40e   :  { %p2232_p3 = pnand %p2230_p2, %p2227_p1 }
 0x410   :  { %2235 = shalt.err (!%p2232_p3)
}
 0x411   :  { %s2253_s4 = smov 128   ;;  %s2254_s5 = smov 8  }
 0x412   :  { %1584 = dma.vmem_to_hbm [thread:$0]  %s1579_s22, 512, %s2568_s3, [#allocation6], %s2253_s4, %s2253_s4, %s2254_s5  }
 0x413   :  { %2242 = dma.done.wait [#allocation6], 512  }
 0x414   :  { %2243 = vsyncadd [#allocation6], 4294966784 }
 0x415   :  { %1588 = vsyncpa [#allocation5], 1 }
 0x416   :  { %1589 = vsyncpa [#allocation8], 1 }
 0x417   :  { %1590 = vsyncpa [#allocation6], 1 }
 0x418   :  { %1591 = vsyncmov [#allocation3] }
 0x41b   :  { %s1592_s8 = vpop.sfrf %1591 }
 0x41c   :  { %p1680_p4 = scmp.ne.s32.totalorder %s1592_s8, 0 }
 0x41e   :  { %1596 = shalt.err (%p1680_p4)  }
 0x41f   :  { %1598 = vsyncmov [#allocation3 + $0x1] }
 0x422   :  { %s1599_s1 = vpop.sfrf %1598 }
 0x423   :  { %p1681_p5 = scmp.ne.s32.totalorder %s1599_s1, 0 }
 0x425   :  { %1603 = shalt.err (%p1681_p5)  }

</bundles_post_ra>
